<compile_context>
chip_gen: v7x
topology: tpu7x:2x2x1
jax: 0.10.0
libtpu: 0.0.40
codegen_flags: <defaults>
</compile_context>

<pallas_src>
import math

import numpy as np
import jax
import jax.numpy as jnp
from jax import lax
from jax.experimental import pallas as pl
from jax.experimental.pallas import tpu as pltpu


_MATMUL_PRECISION = lax.Precision.HIGHEST
_VMEM_LIMIT_BYTES = 32 * 1024 * 1024      # safe scoped limit on v5e..v7x
_VMEM_BUDGET_BYTES = 20 * 1024 * 1024     # headroom under the scoped limit


# ---------------------------------------------------------------------------
# Bilinear (align_corners=False) downsampling weight matrix, PyTorch semantics
# ---------------------------------------------------------------------------
def _bilinear_down_matrix(in_size: int, factor: int) -> np.ndarray:
    """Weight matrix M of shape (out, in) so that y = M @ x reproduces
    F.interpolate(mode='bilinear', align_corners=False, scale_factor=1/factor)
    along one axis (PyTorch: src = factor*(dst+0.5)-0.5, clamped)."""
    out_size = int(math.floor(in_size / factor))
    scale = float(factor)
    dst = np.arange(out_size, dtype=np.float64)
    src = np.maximum(scale * (dst + 0.5) - 0.5, 0.0)
    i0 = np.minimum(np.floor(src).astype(np.int64), in_size - 1)
    i1 = np.minimum(i0 + 1, in_size - 1)
    w1 = src - i0
    w0 = 1.0 - w1
    mat = np.zeros((out_size, in_size), dtype=np.float64)
    mat[np.arange(out_size), i0] += w0
    mat[np.arange(out_size), i1] += w1
    return mat.astype(np.float32)


# ---------------------------------------------------------------------------
# Camera-block size heuristic
# ---------------------------------------------------------------------------
def _choose_camera_block(N, H, W, out_hw, weight_bytes):
    """Largest divisor of N whose VMEM working set fits the budget.
    Prefer a split that yields >= 2 camera blocks (so the 'parallel'
    camera-grid axis gives both v7x TensorCores work); otherwise take the
    largest fitting divisor (biggest tiles on single-TC chips)."""
    per_cam_in = H * W * 4
    per_cam_out = sum(h * w * 4 for h, w in out_hw)

    def vmem_bytes(nb):
        return (2 * nb * per_cam_in          # double-buffered input tile
                + nb * per_cam_in            # f32 accumulator scratch
                + 2 * nb * per_cam_out       # double-buffered output tiles
                + weight_bytes)

    divisors = [d for d in range(1, N + 1) if N % d == 0]
    fitting = [d for d in divisors if vmem_bytes(d) <= _VMEM_BUDGET_BYTES]
    if not fitting:
        return 1
    multi = [d for d in fitting if N // d >= 2]
    return max(multi) if multi else max(fitting)


# ---------------------------------------------------------------------------
# Fused Pallas kernel: accumulate over ragged traversals (hot path), then
# mean + all bilinear downsamples once per sample group (epilogue).
# ---------------------------------------------------------------------------
def _make_fused_kernel(n_factors: int, n_cam_block: int):
    def kernel(gid_ref, off_ref, cnt_ref, x_ref, *rest):
        # rest = (wh_0, wwt_0, ..., wh_{F-1}, wwt_{F-1}, out_0..out_{F-1}, acc)
        w_refs = rest[:2 * n_factors]
        o_refs = rest[2 * n_factors:3 * n_factors]
        acc_ref = rest[3 * n_factors]            # (Nb, H, W) f32 scratch

        t = pl.program_id(1)                     # flattened traversal step
        g = gid_ref[t]                           # sample (group) id
        start = off_ref[g]                       # first step of the group
        cnt = cnt_ref[g]                         # traversals in group (>= 1)
        last = start + cnt - 1                   # last step of the group

        # Hot path: one streamed VPU pass per step (kernel is HBM bound).
        # First step of a group overwrites the accumulator (no zero-init pass).
        @pl.when(t == start)
        def _init():
            acc_ref[...] = x_ref[0].astype(jnp.float32)

        @pl.when(t != start)
        def _accumulate():
            acc_ref[...] += x_ref[0].astype(jnp.float32)

        @pl.when(t == last)
        def _finalize():
            # Once per sample group: separable bilinear downsample on the MXU
            # for every factor / camera.  The 1/count of the mean is applied
            # to the tiny downsampled result, not the full-res accumulator.
            cnt_f = cnt.astype(jnp.float32)
            for i in range(n_factors):
                wh = w_refs[2 * i][...]                          # (h_i, H)
                wwt = w_refs[2 * i + 1][...]                     # (W, w_i)
                for n in range(n_cam_block):
                    tmp = jnp.dot(wh, acc_ref[n],
                                  preferred_element_type=jnp.float32,
                                  precision=_MATMUL_PRECISION)   # (h_i, W)
                    y = jnp.dot(tmp, wwt,
                                preferred_element_type=jnp.float32,
                                precision=_MATMUL_PRECISION)     # (h_i, w_i)
                    o_refs[i][0, n] = (y / cnt_f).astype(o_refs[i].dtype)

    return kernel


def identity_multi_imgs_forward_packed(x, n_traversals,
                                       downsampling_factors=(8, 4, 2),
                                       interpolation_mode="bilinear",
                                       reduction="mean",
                                       camera_block=None):
    """Fused forward on a pre-packed x of shape (T_total, N, H, W).

    Returns a list (one entry per downsampling factor) of (B, N, 1, h, w)
    float32 arrays.  Prefer this entry point when a packed array is already
    available: it avoids the extra HBM copy made by stacking a python list.
    """
    assert interpolation_mode == "bilinear"
    if reduction != "mean":
        # TODO(synk): 'max' reduction not implemented (module default is
        # 'mean'; max does not commute with the fused mean-first formulation).
        raise NotImplementedError()

    counts = np.asarray(n_traversals, dtype=np.int32)
    if counts.ndim != 1 or counts.size == 0 or int(counts.min()) < 1:
        raise ValueError("every sample must have at least one traversal")
    B = int(counts.shape[0])
    T_total, N, H, W = (int(d) for d in x.shape)
    assert int(counts.sum()) == T_total

    offsets = np.zeros((B,), dtype=np.int32)
    offsets[1:] = np.cumsum(counts)[:-1]
    gid = np.repeat(np.arange(B, dtype=np.int32), counts)       # (T_total,)

    # NOTE: kept in f32 for tight agreement with the f32 reference.  Casting
    # to bfloat16 here would halve HBM traffic (the kernel is memory bound)
    # at ~1e-3 accuracy if the caller can tolerate it.
    x = jnp.asarray(x).astype(jnp.float32)

    factors = tuple(int(f) for f in downsampling_factors)
    n_f = len(factors)
    weights, out_hw = [], []
    weight_bytes = 0
    for f in factors:
        wh = _bilinear_down_matrix(H, f)          # (h, H)
        wwt = _bilinear_down_matrix(W, f).T       # (W, w)
        out_hw.append((wh.shape[0], wwt.shape[1]))
        weights += [jnp.asarray(wh), jnp.asarray(wwt)]
        weight_bytes += (wh.size + wwt.size) * 4

    if camera_block is None:
        nb = _choose_camera_block(N, H, W, out_hw, weight_bytes)
    else:
        nb = int(camera_block)
        if nb < 1 or N % nb != 0:
            raise ValueError("camera_block must be a positive divisor of N")
    n_cam_blocks = N // nb

    # --- BlockSpecs ---------------------------------------------------------
    in_specs = [pl.BlockSpec((1, nb, H, W),
                             lambda c, t, gid_r, off_r, cnt_r: (t, c, 0, 0))]
    for (h, w) in out_hw:
        # Weight matrices stay VMEM-resident (constant block index -> DMA'd
        # once, never re-fetched across the grid).
        in_specs.append(pl.BlockSpec((h, H),
                                     lambda c, t, gid_r, off_r, cnt_r: (0, 0)))
        in_specs.append(pl.BlockSpec((W, w),
                                     lambda c, t, gid_r, off_r, cnt_r: (0, 0)))

    def out_index(c, t, gid_r, off_r, cnt_r):
        return (gid_r[t], c, 0, 0)

    out_specs = tuple(pl.BlockSpec((1, nb, h, w), out_index) for (h, w) in out_hw)
    out_shape = tuple(jax.ShapeDtypeStruct((B, N, h, w), jnp.float32)
                      for (h, w) in out_hw)

    grid_spec = pltpu.PrefetchScalarGridSpec(
        num_scalar_prefetch=3,                    # gid, offsets, counts -> SMEM
        grid=(n_cam_blocks, T_total),             # ragged reduction innermost
        in_specs=in_specs,
        out_specs=out_specs,
        scratch_shapes=[pltpu.VMEM((nb, H, W), jnp.float32)],
    )

    outs = pl.pallas_call(
        _make_fused_kernel(n_f, nb),
        out_shape=out_shape,
        grid_spec=grid_spec,
        compiler_params=pltpu.CompilerParams(
            # Camera-block axis parallel -> both TensorCores stream on v7x;
            # the flattened traversal axis is the sequential ragged reduction.
            dimension_semantics=("parallel", "arbitrary"),
            # Working set (2 double-buffered input tiles + acc + weights +
            # small outputs) is kept under ~20 MiB by the Nb heuristic.
            vmem_limit_bytes=_VMEM_LIMIT_BYTES,
        ),
    )(jnp.asarray(gid), jnp.asarray(offsets), jnp.asarray(counts), x, *weights)

    return [o.reshape(B, N, 1, h, w) for o, (h, w) in zip(outs, out_hw)]


# ---------------------------------------------------------------------------
# Module forward: adapter matching the PyTorch list-of-lists input format
# ---------------------------------------------------------------------------
def identity_multi_imgs_forward(hindsight_points_depth_map,
                                downsampling_factors=(8, 4, 2),
                                interpolation_mode="bilinear",
                                reduction="mean",
                                camera_block=None):
    # NOTE: jnp.stack materialises one extra HBM copy of x; callers that
    # already hold a packed (T_total, N, H, W) array should call
    # identity_multi_imgs_forward_packed directly to skip it.
    n_traversals = [len(d) for d in hindsight_points_depth_map]
    flat = [m for sample in hindsight_points_depth_map for m in sample]
    x = jnp.stack(flat)
    return identity_multi_imgs_forward_packed(
        x, n_traversals, downsampling_factors, interpolation_mode, reduction,
        camera_block=camera_block)


# ---------------------------------------------------------------------------
# Pure numpy reference (interpolate-then-mean, PyTorch order) for checking
# ---------------------------------------------------------------------------
def _reference(x_np, counts, factor):
    H, W = x_np.shape[-2:]
    wh = _bilinear_down_matrix(H, factor)
    wwt = _bilinear_down_matrix(W, factor).T
    y = np.einsum("hH,tnHW,Ww->tnhw", wh, x_np, wwt)
    outs, start = [], 0
    for c in counts:
        outs.append(y[start:start + c].mean(axis=0, keepdims=True))
        start += c
    return np.concatenate(outs, axis=0)[:, :, None]   # (B, N, 1, h, w)


if __name__ == "__main__":
    key = jax.random.PRNGKey(0)
    B = 2                     # batch samples
    n_traversals = [3, 2]     # ragged traversal counts per sample
    N, H, W = 2, 16, 16       # images per sample, spatial size
    factors = (8, 4, 2)

    # Build the nested list-of-lists input deterministically.
    depth_maps = []
    for b in range(B):
        sample = []
        for t in range(n_traversals[b]):
            key, sub = jax.random.split(key)
            sample.append(jax.random.uniform(sub, (N, H, W), dtype=jnp.float32))
        depth_maps.append(sample)

    x_np = np.stack([np.asarray(m) for s in depth_maps for m in s])
    counts = np.asarray(n_traversals)

    # Verify against the numpy reference.  Tolerance 1e-4 covers the float
    # reassociation from fusing the mean before the (linear) interpolation
    # and the MXU's multi-pass f32 matmul decomposition.  Exercise both the
    # per-camera tiling path (auto -> nb=1, parallel camera axis) and the
    # camera-blocked path (nb=N).
    ok = True
    for cam_blk in (None, N):
        outs = identity_multi_imgs_forward(depth_maps,
                                           downsampling_factors=factors,
                                           camera_block=cam_blk)
        outs = [jax.block_until_ready(o) for o in outs]
        for f, o in zip(factors, outs):
            ref = _reference(x_np, counts, f)
            expect_shape = (B, N, 1, H // f, W // f)
            ok &= (tuple(o.shape) == expect_shape)
            ok &= bool(np.allclose(np.asarray(o), ref, rtol=1e-4, atol=1e-4))

    print("KERNEL_OK" if ok else "MISMATCH")
</pallas_src>

<mosaic_0001>
module attributes {stable_mosaic.version = 11 : i64} {
  func.func @kernel(%arg0: i32, %arg1: i32, %arg2: memref<5xi32, #tpu.memory_space<smem>>, %arg3: memref<2xi32, #tpu.memory_space<smem>>, %arg4: memref<2xi32, #tpu.memory_space<smem>>, %arg5: memref<1x1x16x16xf32, #tpu.memory_space<vmem>>, %arg6: memref<2x16xf32, #tpu.memory_space<vmem>>, %arg7: memref<16x2xf32, #tpu.memory_space<vmem>>, %arg8: memref<4x16xf32, #tpu.memory_space<vmem>>, %arg9: memref<16x4xf32, #tpu.memory_space<vmem>>, %arg10: memref<8x16xf32, #tpu.memory_space<vmem>>, %arg11: memref<16x8xf32, #tpu.memory_space<vmem>>, %arg12: memref<1x1x2x2xf32, #tpu.memory_space<vmem>>, %arg13: memref<1x1x4x4xf32, #tpu.memory_space<vmem>>, %arg14: memref<1x1x8x8xf32, #tpu.memory_space<vmem>>, %arg15: memref<1x16x16xf32, #tpu.memory_space<vmem>>) attributes {dimension_semantics = [#tpu.dimension_semantics<parallel>, #tpu.dimension_semantics<arbitrary>], iteration_bounds = array<i64: 2, 5>, scalar_prefetch = 3 : i64, scratch_operands = 1 : i64, tpu.core_type = #tpu.core_type<tc>, window_params = [{transform_indices = @transform_0, window_bounds = array<i64: 1, 1, 16, 16>}, {pipeline_mode = #tpu.pipeline_mode<synchronous>, transform_indices = @transform_1, window_bounds = array<i64: 2, 16>}, {pipeline_mode = #tpu.pipeline_mode<synchronous>, transform_indices = @transform_2, window_bounds = array<i64: 16, 2>}, {pipeline_mode = #tpu.pipeline_mode<synchronous>, transform_indices = @transform_3, window_bounds = array<i64: 4, 16>}, {pipeline_mode = #tpu.pipeline_mode<synchronous>, transform_indices = @transform_4, window_bounds = array<i64: 16, 4>}, {pipeline_mode = #tpu.pipeline_mode<synchronous>, transform_indices = @transform_5, window_bounds = array<i64: 8, 16>}, {pipeline_mode = #tpu.pipeline_mode<synchronous>, transform_indices = @transform_6, window_bounds = array<i64: 16, 8>}, {transform_indices = @transform_7, window_bounds = array<i64: 1, 1, 2, 2>}, {transform_indices = @transform_8, window_bounds = array<i64: 1, 1, 4, 4>}, {transform_indices = @transform_9, window_bounds = array<i64: 1, 1, 8, 8>}]} {
    %0 = arith.index_cast %arg1 : i32 to index
    %1 = memref.load %arg2[%0] : memref<5xi32, #tpu.memory_space<smem>>
    %2 = arith.index_cast %1 : i32 to index
    %3 = memref.load %arg3[%2] : memref<2xi32, #tpu.memory_space<smem>>
    %4 = arith.index_cast %1 : i32 to index
    %5 = memref.load %arg4[%4] : memref<2xi32, #tpu.memory_space<smem>>
    %6 = arith.addi %3, %5 : i32
    %c1_i32 = arith.constant 1 : i32
    %7 = arith.subi %6, %c1_i32 : i32
    %8 = arith.cmpi eq, %arg1, %3 : i32
    %9 = arith.extui %8 : i1 to i32
    %c0_i32 = arith.constant 0 : i32
    %10 = arith.cmpi ne, %9, %c0_i32 : i32
    scf.if %10 {
      %c0 = arith.constant 0 : index
      %c0_2 = arith.constant 0 : index
      %c0_3 = arith.constant 0 : index
      %c0_4 = arith.constant 0 : index
      %17 = vector.load %arg5[%c0, %c0_2, %c0_3, %c0_4] : memref<1x1x16x16xf32, #tpu.memory_space<vmem>>, vector<1x1x16x16xf32>
      %18 = vector.shape_cast %17 : vector<1x1x16x16xf32> to vector<1x16x16xf32>
      %c0_5 = arith.constant 0 : index
      %c0_6 = arith.constant 0 : index
      %c0_7 = arith.constant 0 : index
      %19 = vector.load %arg15[%c0_5, %c0_6, %c0_7] : memref<1x16x16xf32, #tpu.memory_space<vmem>>, vector<1x16x16xf32>
      tpu.vector_store %arg15[%c0_5, %c0_6, %c0_7], %18 {strides = array<i32>} : memref<1x16x16xf32, #tpu.memory_space<vmem>>, vector<1x16x16xf32>,
    } else {
    }
    %11 = arith.cmpi ne, %arg1, %3 : i32
    %12 = arith.extui %11 : i1 to i32
    %c0_i32_0 = arith.constant 0 : i32
    %13 = arith.cmpi ne, %12, %c0_i32_0 : i32
    scf.if %13 {
      %c0 = arith.constant 0 : index
      %c0_2 = arith.constant 0 : index
      %c0_3 = arith.constant 0 : index
      %17 = vector.load %arg15[%c0, %c0_2, %c0_3] : memref<1x16x16xf32, #tpu.memory_space<vmem>>, vector<1x16x16xf32>
      %c0_4 = arith.constant 0 : index
      %c0_5 = arith.constant 0 : index
      %c0_6 = arith.constant 0 : index
      %c0_7 = arith.constant 0 : index
      %18 = vector.load %arg5[%c0_4, %c0_5, %c0_6, %c0_7] : memref<1x1x16x16xf32, #tpu.memory_space<vmem>>, vector<1x1x16x16xf32>
      %19 = vector.shape_cast %18 : vector<1x1x16x16xf32> to vector<1x16x16xf32>
      %20 = arith.addf %17, %19 : vector<1x16x16xf32>
      %c0_8 = arith.constant 0 : index
      %c0_9 = arith.constant 0 : index
      %c0_10 = arith.constant 0 : index
      %21 = vector.load %arg15[%c0_8, %c0_9, %c0_10] : memref<1x16x16xf32, #tpu.memory_space<vmem>>, vector<1x16x16xf32>
      tpu.vector_store %arg15[%c0_8, %c0_9, %c0_10], %20 {strides = array<i32>} : memref<1x16x16xf32, #tpu.memory_space<vmem>>, vector<1x16x16xf32>,
    } else {
    }
    %14 = arith.cmpi eq, %arg1, %7 : i32
    %15 = arith.extui %14 : i1 to i32
    %c0_i32_1 = arith.constant 0 : i32
    %16 = arith.cmpi ne, %15, %c0_i32_1 : i32
    scf.if %16 {
      %17 = arith.sitofp %5 : i32 to f32
      %c0 = arith.constant 0 : index
      %c0_2 = arith.constant 0 : index
      %18 = vector.load %arg6[%c0, %c0_2] : memref<2x16xf32, #tpu.memory_space<vmem>>, vector<2x16xf32>
      %c0_3 = arith.constant 0 : index
      %c0_4 = arith.constant 0 : index
      %19 = vector.load %arg7[%c0_3, %c0_4] : memref<16x2xf32, #tpu.memory_space<vmem>>, vector<16x2xf32>
      %c0_5 = arith.constant 0 : index
      %c0_6 = arith.constant 0 : index
      %c0_7 = arith.constant 0 : index
      %20 = vector.load %arg15[%c0_5, %c0_6, %c0_7] : memref<1x16x16xf32, #tpu.memory_space<vmem>>, vector<1x16x16xf32>
      %21 = vector.shape_cast %20 : vector<1x16x16xf32> to vector<16x16xf32>
      %cst = arith.constant dense<0.000000e+00> : vector<2x16xf32>
      %22 = tpu.matmul %18, %21, %cst {dimension_numbers = #tpu.dot_dimension_numbers<[1], [0], [0], [1], [0, 0, 1, 1], [], []>, precision = #tpu.contract_precision<fp32>} : vector<2x16xf32>, vector<16x16xf32>, vector<2x16xf32> -> vector<2x16xf32>
      %cst_8 = arith.constant dense<0.000000e+00> : vector<2x2xf32>
      %23 = tpu.matmul %22, %19, %cst_8 {dimension_numbers = #tpu.dot_dimension_numbers<[1], [0], [0], [1], [0, 0, 1, 1], [], []>, precision = #tpu.contract_precision<fp32>} : vector<2x16xf32>, vector<16x2xf32>, vector<2x2xf32> -> vector<2x2xf32>
      %24 = vector.broadcast %17 : f32 to vector<2x2xf32>
      %25 = arith.divf %23, %24 : vector<2x2xf32>
      %c0_9 = arith.constant 0 : index
      %c0_10 = arith.constant 0 : index
      %c0_11 = arith.constant 0 : index
      %c0_12 = arith.constant 0 : index
      %26 = vector.load %arg12[%c0_9, %c0_10, %c0_11, %c0_12] : memref<1x1x2x2xf32, #tpu.memory_space<vmem>>, vector<1x1x2x2xf32>
      %27 = vector.shape_cast %26 : vector<1x1x2x2xf32> to vector<2x2xf32>
      %28 = vector.shape_cast %25 : vector<2x2xf32> to vector<1x1x2x2xf32>
      tpu.vector_store %arg12[%c0_9, %c0_10, %c0_11, %c0_12], %28 {strides = array<i32>} : memref<1x1x2x2xf32, #tpu.memory_space<vmem>>, vector<1x1x2x2xf32>,
      %c0_13 = arith.constant 0 : index
      %c0_14 = arith.constant 0 : index
      %29 = vector.load %arg8[%c0_13, %c0_14] : memref<4x16xf32, #tpu.memory_space<vmem>>, vector<4x16xf32>
      %c0_15 = arith.constant 0 : index
      %c0_16 = arith.constant 0 : index
      %30 = vector.load %arg9[%c0_15, %c0_16] : memref<16x4xf32, #tpu.memory_space<vmem>>, vector<16x4xf32>
      %c0_17 = arith.constant 0 : index
      %c0_18 = arith.constant 0 : index
      %c0_19 = arith.constant 0 : index
      %31 = vector.load %arg15[%c0_17, %c0_18, %c0_19] : memref<1x16x16xf32, #tpu.memory_space<vmem>>, vector<1x16x16xf32>
      %32 = vector.shape_cast %31 : vector<1x16x16xf32> to vector<16x16xf32>
      %cst_20 = arith.constant dense<0.000000e+00> : vector<4x16xf32>
      %33 = tpu.matmul %29, %32, %cst_20 {dimension_numbers = #tpu.dot_dimension_numbers<[1], [0], [0], [1], [0, 0, 1, 1], [], []>, precision = #tpu.contract_precision<fp32>} : vector<4x16xf32>, vector<16x16xf32>, vector<4x16xf32> -> vector<4x16xf32>
      %cst_21 = arith.constant dense<0.000000e+00> : vector<4x4xf32>
      %34 = tpu.matmul %33, %30, %cst_21 {dimension_numbers = #tpu.dot_dimension_numbers<[1], [0], [0], [1], [0, 0, 1, 1], [], []>, precision = #tpu.contract_precision<fp32>} : vector<4x16xf32>, vector<16x4xf32>, vector<4x4xf32> -> vector<4x4xf32>
      %35 = vector.broadcast %17 : f32 to vector<4x4xf32>
      %36 = arith.divf %34, %35 : vector<4x4xf32>
      %c0_22 = arith.constant 0 : index
      %c0_23 = arith.constant 0 : index
      %c0_24 = arith.constant 0 : index
      %c0_25 = arith.constant 0 : index
      %37 = vector.load %arg13[%c0_22, %c0_23, %c0_24, %c0_25] : memref<1x1x4x4xf32, #tpu.memory_space<vmem>>, vector<1x1x4x4xf32>
      %38 = vector.shape_cast %37 : vector<1x1x4x4xf32> to vector<4x4xf32>
      %39 = vector.shape_cast %36 : vector<4x4xf32> to vector<1x1x4x4xf32>
      tpu.vector_store %arg13[%c0_22, %c0_23, %c0_24, %c0_25], %39 {strides = array<i32>} : memref<1x1x4x4xf32, #tpu.memory_space<vmem>>, vector<1x1x4x4xf32>,
      %c0_26 = arith.constant 0 : index
      %c0_27 = arith.constant 0 : index
      %40 = vector.load %arg10[%c0_26, %c0_27] : memref<8x16xf32, #tpu.memory_space<vmem>>, vector<8x16xf32>
      %c0_28 = arith.constant 0 : index
      %c0_29 = arith.constant 0 : index
      %41 = vector.load %arg11[%c0_28, %c0_29] : memref<16x8xf32, #tpu.memory_space<vmem>>, vector<16x8xf32>
      %c0_30 = arith.constant 0 : index
      %c0_31 = arith.constant 0 : index
      %c0_32 = arith.constant 0 : index
      %42 = vector.load %arg15[%c0_30, %c0_31, %c0_32] : memref<1x16x16xf32, #tpu.memory_space<vmem>>, vector<1x16x16xf32>
      %43 = vector.shape_cast %42 : vector<1x16x16xf32> to vector<16x16xf32>
      %cst_33 = arith.constant dense<0.000000e+00> : vector<8x16xf32>
      %44 = tpu.matmul %40, %43, %cst_33 {dimension_numbers = #tpu.dot_dimension_numbers<[1], [0], [0], [1], [0, 0, 1, 1], [], []>, precision = #tpu.contract_precision<fp32>} : vector<8x16xf32>, vector<16x16xf32>, vector<8x16xf32> -> vector<8x16xf32>
      %cst_34 = arith.constant dense<0.000000e+00> : vector<8x8xf32>
      %45 = tpu.matmul %44, %41, %cst_34 {dimension_numbers = #tpu.dot_dimension_numbers<[1], [0], [0], [1], [0, 0, 1, 1], [], []>, precision = #tpu.contract_precision<fp32>} : vector<8x16xf32>, vector<16x8xf32>, vector<8x8xf32> -> vector<8x8xf32>
      %46 = vector.broadcast %17 : f32 to vector<8x8xf32>
      %47 = arith.divf %45, %46 : vector<8x8xf32>
      %c0_35 = arith.constant 0 : index
      %c0_36 = arith.constant 0 : index
      %c0_37 = arith.constant 0 : index
      %c0_38 = arith.constant 0 : index
      %48 = vector.load %arg14[%c0_35, %c0_36, %c0_37, %c0_38] : memref<1x1x8x8xf32, #tpu.memory_space<vmem>>, vector<1x1x8x8xf32>
      %49 = vector.shape_cast %48 : vector<1x1x8x8xf32> to vector<8x8xf32>
      %50 = vector.shape_cast %47 : vector<8x8xf32> to vector<1x1x8x8xf32>
      tpu.vector_store %arg14[%c0_35, %c0_36, %c0_37, %c0_38], %50 {strides = array<i32>} : memref<1x1x8x8xf32, #tpu.memory_space<vmem>>, vector<1x1x8x8xf32>,
    } else {
    }
    return
  }
  func.func @transform_0(%arg0: i32, %arg1: i32, %arg2: memref<5xi32, #tpu.memory_space<smem>>, %arg3: memref<2xi32, #tpu.memory_space<smem>>, %arg4: memref<2xi32, #tpu.memory_space<smem>>) -> (i32, i32, i32, i32) {
    %c0_i32 = arith.constant 0 : i32
    %c0_i32_0 = arith.constant 0 : i32
    %c0_i32_1 = arith.constant 0 : i32
    return %arg1, %arg0, %c0_i32, %c0_i32_0 : i32, i32, i32, i32
  }
  func.func @transform_1(%arg0: i32, %arg1: i32, %arg2: memref<5xi32, #tpu.memory_space<smem>>, %arg3: memref<2xi32, #tpu.memory_space<smem>>, %arg4: memref<2xi32, #tpu.memory_space<smem>>) -> (i32, i32) {
    %c0_i32 = arith.constant 0 : i32
    %c0_i32_0 = arith.constant 0 : i32
    %c0_i32_1 = arith.constant 0 : i32
    return %c0_i32, %c0_i32_0 : i32, i32
  }
  func.func @transform_2(%arg0: i32, %arg1: i32, %arg2: memref<5xi32, #tpu.memory_space<smem>>, %arg3: memref<2xi32, #tpu.memory_space<smem>>, %arg4: memref<2xi32, #tpu.memory_space<smem>>) -> (i32, i32) {
    %c0_i32 = arith.constant 0 : i32
    %c0_i32_0 = arith.constant 0 : i32
    %c0_i32_1 = arith.constant 0 : i32
    return %c0_i32, %c0_i32_0 : i32, i32
  }
  func.func @transform_3(%arg0: i32, %arg1: i32, %arg2: memref<5xi32, #tpu.memory_space<smem>>, %arg3: memref<2xi32, #tpu.memory_space<smem>>, %arg4: memref<2xi32, #tpu.memory_space<smem>>) -> (i32, i32) {
    %c0_i32 = arith.constant 0 : i32
    %c0_i32_0 = arith.constant 0 : i32
    %c0_i32_1 = arith.constant 0 : i32
    return %c0_i32, %c0_i32_0 : i32, i32
  }
  func.func @transform_4(%arg0: i32, %arg1: i32, %arg2: memref<5xi32, #tpu.memory_space<smem>>, %arg3: memref<2xi32, #tpu.memory_space<smem>>, %arg4: memref<2xi32, #tpu.memory_space<smem>>) -> (i32, i32) {
    %c0_i32 = arith.constant 0 : i32
    %c0_i32_0 = arith.constant 0 : i32
    %c0_i32_1 = arith.constant 0 : i32
    return %c0_i32, %c0_i32_0 : i32, i32
  }
  func.func @transform_5(%arg0: i32, %arg1: i32, %arg2: memref<5xi32, #tpu.memory_space<smem>>, %arg3: memref<2xi32, #tpu.memory_space<smem>>, %arg4: memref<2xi32, #tpu.memory_space<smem>>) -> (i32, i32) {
    %c0_i32 = arith.constant 0 : i32
    %c0_i32_0 = arith.constant 0 : i32
    %c0_i32_1 = arith.constant 0 : i32
    return %c0_i32, %c0_i32_0 : i32, i32
  }
  func.func @transform_6(%arg0: i32, %arg1: i32, %arg2: memref<5xi32, #tpu.memory_space<smem>>, %arg3: memref<2xi32, #tpu.memory_space<smem>>, %arg4: memref<2xi32, #tpu.memory_space<smem>>) -> (i32, i32) {
    %c0_i32 = arith.constant 0 : i32
    %c0_i32_0 = arith.constant 0 : i32
    %c0_i32_1 = arith.constant 0 : i32
    return %c0_i32, %c0_i32_0 : i32, i32
  }
  func.func @transform_7(%arg0: i32, %arg1: i32, %arg2: memref<5xi32, #tpu.memory_space<smem>>, %arg3: memref<2xi32, #tpu.memory_space<smem>>, %arg4: memref<2xi32, #tpu.memory_space<smem>>) -> (i32, i32, i32, i32) {
    %0 = arith.index_cast %arg1 : i32 to index
    %1 = memref.load %arg2[%0] : memref<5xi32, #tpu.memory_space<smem>>
    %c0_i32 = arith.constant 0 : i32
    %c0_i32_0 = arith.constant 0 : i32
    %c0_i32_1 = arith.constant 0 : i32
    return %1, %arg0, %c0_i32, %c0_i32_0 : i32, i32, i32, i32
  }
  func.func @transform_8(%arg0: i32, %arg1: i32, %arg2: memref<5xi32, #tpu.memory_space<smem>>, %arg3: memref<2xi32, #tpu.memory_space<smem>>, %arg4: memref<2xi32, #tpu.memory_space<smem>>) -> (i32, i32, i32, i32) {
    %0 = arith.index_cast %arg1 : i32 to index
    %1 = memref.load %arg2[%0] : memref<5xi32, #tpu.memory_space<smem>>
    %c0_i32 = arith.constant 0 : i32
    %c0_i32_0 = arith.constant 0 : i32
    %c0_i32_1 = arith.constant 0 : i32
    return %1, %arg0, %c0_i32, %c0_i32_0 : i32, i32, i32, i32
  }
  func.func @transform_9(%arg0: i32, %arg1: i32, %arg2: memref<5xi32, #tpu.memory_space<smem>>, %arg3: memref<2xi32, #tpu.memory_space<smem>>, %arg4: memref<2xi32, #tpu.memory_space<smem>>) -> (i32, i32, i32, i32) {
    %0 = arith.index_cast %arg1 : i32 to index
    %1 = memref.load %arg2[%0] : memref<5xi32, #tpu.memory_space<smem>>
    %c0_i32 = arith.constant 0 : i32
    %c0_i32_0 = arith.constant 0 : i32
    %c0_i32_1 = arith.constant 0 : i32
    return %1, %arg0, %c0_i32, %c0_i32_0 : i32, i32, i32, i32
  }
}

</mosaic_0001>

<bundles_post_ra>
// kernel: tpu_custom_call.1
= control target key start
LH: loop header
LB: loop body
LE: loop exit
PB: predicated region body
PF: predicated region fallthrough
CT: control target
= control target key end

     0   :  { %s5212_s0 = inlined_call_operand.vmem [shape: s32[5], index: 0, kind: input, shape index: {}]   ;;  %s5213_s3 = inlined_call_operand.hbm [shape: f32[5,2,16,16], index: 3, kind: input, shape index: {}]   ;;  %s5214_s4 = inlined_call_operand.vmem [shape: f32[2,16], index: 4, kind: input, shape index: {}]   ;;  %s5215_s5 = inlined_call_operand.vmem [shape: f32[16,2], index: 5, kind: input, shape index: {}]   ;;  %s5216_s6 = inlined_call_operand.vmem [shape: f32[4,16], index: 6, kind: input, shape index: {}]   ;;  %s5217_s7 = inlined_call_operand.vmem [shape: f32[16,4], index: 7, kind: input, shape index: {}]   ;;  %s5218_s8 = inlined_call_operand.vmem [shape: f32[8,16], index: 8, kind: input, shape index: {}]   ;;  %s5219_s9 = inlined_call_operand.vmem [shape: f32[16,8], index: 9, kind: input, shape index: {}]   ;;  %s5220_s10 = inlined_call_operand.hbm [shape: f32[2,2,2,2], index: 10, kind: output, shape index: {0}]   ;;  %s5221_s11 = inlined_call_operand.hbm [shape: f32[2,2,4,4], index: 11, kind: output, shape index: {1}]   ;;  %s5222_s12 = inlined_call_operand.hbm [shape: f32[2,2,8,8], index: 12, kind: output, shape index: {2}]   ;;  %s5223_s1 = inlined_call_operand.vmem [shape: s32[2], index: 1, kind: input, shape index: {}]   ;;  %s5224_s2 = inlined_call_operand.vmem [shape: s32[2], index: 2, kind: input, shape index: {}]  }
   0x1   :  { %5261 = sst [smem:[#allocation44_spill]] %s5213_s3  ;;  %s18_s23 = sshll.u32 %s5212_s0, 4  ;;  %s19_s23 = int_to_ptr.vmem [resolvable:$true] %s18_s23 }
   0x2   :  { %5262 = sst [smem:[#allocation45_spill]] %s5214_s4  ;;  %s22_s26 = sshll.u32 %s5223_s1, 4  ;;  %s23_s26 = int_to_ptr.vmem [resolvable:$true] %s22_s26 }
   0x3   :  { %5263 = sst [smem:[#allocation46_spill]] %s5215_s5  ;;  %s4190_s27 = scalar_lea.vmem %s19_s23, 16 }
   0x4   :  { %5264 = sst [smem:[#allocation47_spill]] %s5216_s6  ;;  %p4191_p0 = scmp.ne.s32.totalorder %s19_s23, %s4190_s27 }
   0x5   :  { %5265 = sst [smem:[#allocation48_spill]] %s5217_s7  ;;  %p4195_p1 = scmp.lt.s32.totalorder %s19_s23, %s19_s23 }
   0x6   :  { %5266 = sst [smem:[#allocation49_spill]] %s5218_s8  ;;  %p4196_p2 = scmp.lt.s32.totalorder %s4190_s27, %s4190_s27 }
   0x7   :  { %5267 = sst [smem:[#allocation50_spill]] %s5219_s9 }
   0x8   :  { %5268 = sst [smem:[#allocation51_spill]] %s5220_s10  ;;  %p4197_p3 = por %p4196_p2, %p4195_p1 }
   0x9   :  { %5269 = sst [smem:[#allocation52_spill]] %s5221_s11 }
   0xa   :  { %5270 = sst [smem:[#allocation53_spill]] %s5222_s12  ;;  %p4198_p4 = pnand %p4197_p3, %p4191_p0 }
   0xc   :  { %4201 = shalt.err (!%p4198_p4)  }
   0xd   :  { %s4494_s28 = smov [#allocation4]   ;;  %s4202_s29 = scalar_lea.vmem %s23_s26, 16 }
   0xe   :  { %21 = dma.vmem_to_smem %s19_s23, 16, %s4494_s28, [#allocation3] }
   0xf   :  { %p4203_p5 = scmp.ne.s32.totalorder %s23_s26, %s4202_s29  ;;  %p4207_p6 = scmp.lt.s32.totalorder %s23_s26, %s23_s26 }
  0x10   :  { %p4208_p7 = scmp.lt.s32.totalorder %s4202_s29, %s4202_s29 }
  0x12   :  { %p4209_p8 = por %p4208_p7, %p4207_p6 }
  0x14   :  { %p4210_p9 = pnand %p4209_p8, %p4203_p5 }
  0x16   :  { %4213 = shalt.err (!%p4210_p9)  }
  0x17   :  { %s4495_s0 = smov [#allocation5]   ;;  %s26_s13 = sshll.u32 %s5224_s2, 4  ;;  %s27_s13 = int_to_ptr.vmem [resolvable:$true] %s26_s13 }
  0x18   :  { %25 = dma.vmem_to_smem %s23_s26, 16, %s4495_s0, [#allocation3] }
  0x19   :  { %s4214_s14 = scalar_lea.vmem %s27_s13, 16  ;;  %p4219_p11 = scmp.lt.s32.totalorder %s27_s13, %s27_s13 }
  0x1a   :  { %p4215_p10 = scmp.ne.s32.totalorder %s27_s13, %s4214_s14  ;;  %p4220_p12 = scmp.lt.s32.totalorder %s4214_s14, %s4214_s14 }
  0x1c   :  { %p4221_p13 = por %p4220_p12, %p4219_p11 }
  0x1e   :  { %p4222_p0 = pnand %p4221_p13, %p4215_p10 }
  0x20   :  { %4225 = shalt.err (!%p4222_p0)  }
  0x21   :  { %s4496_s15 = smov [#allocation6]  }
  0x22   :  { %29 = dma.vmem_to_smem %s27_s13, 16, %s4496_s15, [#allocation3] }
  0x23   :  { %4408 = dma.done.wait [#allocation3], 48 }
  0x24   :  { %4409 = vsyncadd [#allocation3], 4294967248 }
  0x25   :  { %31 = sfence }
  0x26   :  { %32 = vsyncpa [#allocation8], 0 }
  0x27   :  { %34 = vsyncpa [#allocation8 + $0x1], 0 }
  0x28   :  { %35 = vsyncpa [#allocation9], 0 }
  0x29   :  { %37 = vsyncpa [#allocation9 + $0x1], 0 }
  0x2a   :  { %38 = vsyncpa [#allocation12], 0 }
  0x2b   :  { %40 = vsyncpa [#allocation12 + $0x1], 0  ;;  %s4580_s2 = smov 0   ;;  %s4582_s16 = smov 0  }
  0x2c   :  { %s4584_s17 = smov 0   ;;  %s4586_s18 = smov 0  }
  0x2d   :  { %s4588_s19 = smov 0   ;;  %s4590_s20 = smov 0  }
  0x2e   :  { %s4592_s21 = smov 0   ;;  %s4594_s22 = smov 0  }
  0x2f   :  { %s4596_s23 = smov 0   ;;  %s4598_s24 = smov 0  }
  0x30   :  { %s4600_s25 = smov 0   ;;  %s4602_s26 = smov 0  }
  0x31   :  { %s4604_s27 = smov 0   ;;  %s4606_s28 = smov 0  }
  0x32   :  { %s4608_s29 = smov 0   ;;  %s4610_s0 = smov 0  }
  0x33   :  { %s4612_s1 = smov 0  }
  0x34 LB: > { %5271 = sst [smem:[#allocation22_spill]] %s4432_s16  ;;  %s4664_s30 = sadd.s32 4294967295, %s4492_s1   ;;  %s4492_s1 = sphi %s4612_s1, %s46_s1   ;;  %s4488_s0 = sphi %s4610_s0, %s5348_s0   ;;  %s4484_s29 = sphi %s4608_s29, %s5347_s29   ;;  %s4480_s28 = sphi %s4606_s28, %s5346_s28   ;;  %s4476_s27 = sphi %s4604_s27, %s5345_s27   ;;  %s4472_s26 = sphi %s4602_s26, %s5344_s26   ;;  %s4468_s25 = sphi %s4600_s25, %s5343_s25   ;;  %s4464_s24 = sphi %s4598_s24, %s5342_s24   ;;  %s4460_s23 = sphi %s4596_s23, %s5341_s23   ;;  %s4456_s22 = sphi %s4594_s22, %s5352_s22   ;;  %s4452_s21 = sphi %s4592_s21, %s5351_s21   ;;  %s4448_s20 = sphi %s4590_s20, %s5339_s20   ;;  %s4444_s19 = sphi %s4588_s19, %s5338_s19   ;;  %s4440_s18 = sphi %s4586_s18, %s5337_s18   ;;  %s4436_s17 = sphi %s4584_s17, %s5350_s17   ;;  %s4432_s16 = sphi %s4582_s16, %s5349_s16   ;;  %s4428_s2 = sphi %s4580_s2, %s5335_s2  }
  0x35   : > { %5272 = sst [smem:[#allocation23_spill]] %s4444_s19  ;;  %s55_s14 = sadd.s32 1, %s4484_s29 }
  0x36   : > { %5273 = sst [smem:[#allocation24_spill]] %s4448_s20  ;;  %s58_s15 = sadd.s32 1, %s4488_s0 }
  0x37   : > { %5274 = sst [smem:[#allocation25_spill]] %s4452_s21  ;;  %p56_p1 = scmp.ge.s32.totalorder %s55_s14, 5 }
  0x38   : > { %5275 = sst [smem:[#allocation26_spill]] %s4460_s23  ;;  %s67_s12 = sadd.s32 1, %s4472_s26 }
  0x39   : > { %5276 = sst [smem:[#allocation27_spill]] %s4468_s25  ;;  %p74_p2 = scmp.ne.s32.totalorder %s4472_s26, %s4468_s25 }
  0x3a   : > { %5277 = sst [smem:[#allocation28_spill]] %s4472_s26  ;;  %p75_p3 = scmp.eq.s32.totalorder %s4492_s1, 0 }
  0x3b   : > { %5278 = sst [smem:[#allocation29_spill]] %s4480_s28  ;;  %s5354_s14 = smov (%p56_p1, %s55_s14), 0 }
  0x3c   : > { %5279 = sst [smem:[#allocation30_spill]] %s4484_s29  ;;  %s5356_s15 = smov (!%p56_p1, %s58_s15), %s4488_s0 }
  0x3d   : > { %5280 = sst [smem:[#allocation31_spill]] %s4488_s0  ;;  %s62_s10 = ssub.s32 %s4484_s29, %s5354_s14 }
  0x3e   : > { %5281 = sst [smem:[#allocation32_spill]] %s4664_s30  ;;  %p4678_p4 = por %p75_p3, %p74_p2 }
  0x3f   : > { %5282 = sst [smem:[#allocation33_spill]] %s5354_s14  ;;  %p60_p5 = scmp.ge.s32.totalorder %s5356_s15, 2 }
  0x40   : > { %p80_p6 = scmp.ne.s32.totalorder %s4468_s25, %s4464_s24  ;;  %p81_p7 = scmp.eq.s32.totalorder %s4664_s30, 0 }
  0x41   : > { %s216_s11 = sld [smem:[#allocation4 + %s4484_s29]]  ;;  %s5358_s15 = smov (%p60_p5, %s5356_s15), 0 }
  0x42   : > { %5284 = sst [smem:[#allocation34_spill]] %s5358_s15  ;;  %p4687_p8 = por %p81_p7, %p80_p6 }
  0x43   : > { %s217_s9 = sld [smem:[#allocation4 + %s5354_s14]]  ;;  %s4694_s7 = ssub.s32 %s4488_s0, %s5358_s15 }
  0x44   : > { %s223_s5 = sadd.s32 1, %s4460_s23  ;;  %s64_s24 = sor.u32 %s4694_s7, %s62_s10 }
  0x45   : > { %p233_p9 = scmp.ne.s32.totalorder %s4460_s23, %s4456_s22  ;;  %p65_p10 = scmp.eq.s32.totalorder %s64_s24, 0 }
  0x46   : > { %p234_p11 = scmp.eq.s32.totalorder %s4664_s30, 9  ;;  %p239_p12 = scmp.ne.s32.totalorder %s4456_s22, %s4452_s21 }
  0x47   : > { %s5286_s8 = sadd.s32 4294967294, %s4492_s1   ;;  %p263_p3 = scmp.ne.s32.totalorder %s4448_s20, %s4444_s19 }
  0x48   : > { %p4705_p13 = scmp.eq.s32.totalorder %s5286_s8, 9  ;;  %p4714_p0 = por %p234_p11, %p233_p9 }
  0x49   : > { %s4710_s6 = scalar_select %p65_p10, %s4472_s26, %s67_s12  }
  0x4a   : > { %s218_s10 = ssub.s32 %s216_s11, %s217_s9  ;;  %p4721_p1 = por %p4705_p13, %p239_p12 }
  0x4b   : > { %5288 = sst [smem:[#allocation35_spill]] %s4710_s6  ;;  %s220_s21 = sor.u32 %s218_s10, %s4694_s7 }
  0x4c   : > { %s5289_s24 = scalar_select %p4714_p0, 1, 0 }
  0x4d   : > { %s5291_s8 = scalar_select %p4721_p1, 1, 0 }
  0x4e   : > { %5290 = sst [smem:[#allocation36_spill]] %s5289_s24  ;;  %p221_p2 = scmp.eq.s32.totalorder %s220_s21, 0 }
  0x4f   : > { %5292 = sst [smem:[#allocation37_spill]] %s5291_s8  ;;  %s253_s11 = sadd.s32 1, %s4448_s20 }
  0x50   : > { %s246_s12 = sld [smem:[#allocation4 + %s4484_s29]]  ;;  %p269_p5 = scmp.ne.s32.totalorder %s4444_s19, %s4440_s18 }
  0x51   : > { %s247_s9 = sld [smem:[#allocation4 + %s5354_s14]]  ;;  %p4739_p6 = por %p263_p3, %p234_p11 }
  0x52   : > { %s4729_s6 = scalar_select %p221_p2, %s4460_s23, %s223_s5  }
  0x53   : > { %s276_s10 = sld [smem:[#allocation4 + %s4484_s29]]  ;;  %p4745_p7 = por %p269_p5, %p4705_p13 }
  0x54   : > { %5293 = sst [smem:[#allocation38_spill]] %s4729_s6  ;;  %s283_s5 = sadd.s32 1, %s4436_s17 }
  0x55   : > { %s277_s24 = sld [smem:[#allocation4 + %s5354_s14]]  ;;  %p293_p9 = scmp.ne.s32.totalorder %s4436_s17, %s4432_s16 }
  0x56   : > { %s5294_s8 = scalar_select %p4739_p6, 1, 0 }
  0x57   : > { %s5296_s21 = scalar_select %p4745_p7, 1, 0 }
  0x58   : > { %5295 = sst [smem:[#allocation39_spill]] %s5294_s8  ;;  %s248_s18 = ssub.s32 %s246_s12, %s247_s9 }
  0x59   : > { %5297 = sst [smem:[#allocation40_spill]] %s5296_s21  ;;  %p299_p10 = scmp.ne.s32.totalorder %s4432_s16, %s4428_s2 }
  0x5a   : > { %s250_s6 = sor.u32 %s248_s18, %s4694_s7  ;;  %p4757_p12 = por %p293_p9, %p234_p11 }
  0x5b   : > { %p251_p2 = scmp.eq.s32.totalorder %s250_s6, 0  ;;  %p4763_p3 = por %p299_p10, %p4705_p13 }
  0x5c   : > { %s5298_s14 = scalar_select %p4757_p12, 1, 0 }
  0x5d   : > { %s5300_s23 = scalar_select %p4763_p3, 1, 0 }
  0x5e   : > { %5299 = sst [smem:[#allocation41_spill]] %s5298_s14  ;;  %s278_s21 = ssub.s32 %s276_s10, %s277_s24 }
  0x5f   : > { %s4768_s8 = scalar_select %p251_p2, %s4448_s20, %s253_s11  }
  0x60   : > { %s280_s4 = sor.u32 %s278_s21, %s4694_s7  ;;  %p4042_p5 = scmp.lt.s32.totalorder %s4492_s1, 10 }
  0x61   : > { %5301 = sst [smem:[#allocation42_spill]] %s4768_s8  ;;  %p281_p7 = scmp.eq.s32.totalorder %s280_s4, 0 }
  0x62   : > { %s338_s2 = sand.u32 1, %s4472_s26   ;;  %s3463_s18 = sshll.u32 %s4488_s0, 1 }
  0x63   : > { %s3462_s12 = sshll.u32 %s338_s2, 4  ;;  %s3464_s30 = sshll.u32 %s4484_s29, 2 }
  0x64   : > { %s4774_s9 = scalar_select %p281_p7, %s4436_s17, %s283_s5  }
  0x65   : > { %s342_s14 = scalar_lea.vmem [#allocation7], %s3462_s12  ;;  %s348_s15 = sadd.s32 %s3464_s30, %s3463_s18 }
  0x66   : > { %5302 = sst [smem:[#allocation43_spill]] %s4774_s9  ;;  %s351_s6 = sshll.u32 %s342_s14, 4  ;;  %s4778_s6 = int_to_ptr.vmem [resolvable:$true] %s351_s6 }
  0x67   : > { %s3465_s16 = sshll.u32 %s348_s15, 7  ;;  %p4782_p11 = pnand %p4042_p5, %p4678_p4 }
  0x68   : > { %s5304_s3 = sld [smem:[#allocation44_spill]]  ;;  %s4791_s30 = scalar_lea.sflag [#allocation8], %s338_s2 }
  0x69   : > { %p4228_p4 = pneg %p4782_p11 }
  0x6e   : > { %s4789_s4 = scalar_lea.hbm %s5304_s3, %s3465_s16  ;;  %s4231_s21 = scalar_lea.hbm %s5304_s3, 2560 }
  0x6f   : > { %s4226_s14 = scalar_lea.hbm %s4789_s4, 256  ;;  %p4232_p10 = scmp.lt.u32.totalorder %s4789_s4, %s5304_s3 }
  0x70   : > { %p4227_p13 = scmp.ne.s32.totalorder %s4789_s4, %s4226_s14  ;;  %p4233_p2 = scmp.lt.u32.totalorder %s4231_s21, %s4226_s14 }
  0x71   : > { %p4235_p3 = scmp.lt.u32.totalorder %s4226_s14, %s4789_s4 }
  0x72   : > { %p4229_p7 = pnand %p4228_p4, %p4227_p13  ;;  %p4234_p5 = por %p4233_p2, %p4232_p10 }
  0x74   : > { %p4230_p9 = pneg %p4229_p7  ;;  %p4236_p1 = por %p4235_p3, %p4234_p5 }
  0x76   : > { %p4237_p12 = pnand %p4236_p1, %p4230_p9 }
  0x78   : > { %4240 = shalt.err (!%p4237_p12)
}
  0x79   : > { %s4241_s2 = scalar_lea.vmem %s4778_s6, 256  ;;  %s4497_s12 = smov [#allocation7]  }
  0x7a   : > { %p4242_p13 = scmp.ne.s32.totalorder %s4778_s6, %s4241_s2  ;;  %s4246_s18 = sshll.u32 %s4497_s12, 4  ;;  %s4247_s18 = int_to_ptr.vmem [resolvable:$false] %s4246_s18 }
  0x7b   : > { %s4248_s15 = scalar_lea.vmem %s4247_s18, 512  ;;  %p4249_p6 = scmp.lt.s32.totalorder %s4778_s6, %s4247_s18 }
  0x7c   : > { %p4244_p7 = pnand %p4242_p13, %p4228_p4  ;;  %p4250_p10 = scmp.lt.s32.totalorder %s4248_s15, %s4241_s2 }
  0x7e   : > { %p4245_p0 = pneg %p4244_p7  ;;  %p4251_p2 = por %p4250_p10, %p4249_p6 }
  0x80   : > { %p4252_p3 = pnand %p4251_p2, %p4245_p0 }
  0x82   : > { %4255 = shalt.err (!%p4252_p3)
}
  0x83   : > { %s4498_s7 = smov 128   ;;  %s4499_s11 = smov 8  }
  0x84   : > { %4031 = dma.hbm_to_vmem [thread:$0]  (!%p4782_p11), %s4789_s4, 256, %s4778_s6, %s4791_s30, %s4498_s7, %s4498_s7, %s4499_s11  }
  0x85   : > { %p3466_p1 = scmp.ge.s32.totalorder %s4492_s1, 1  ;;  %p359_p12 = scmp.lt.s32.totalorder %s4492_s1, 11 }
  0x87   : > { %p360_p4 = pnand %p3466_p1, %p359_p12 }
  0x88   : > { %s365_s14 = sand.u32 (!%p360_p4), 1, %s4468_s25  }
  0x89   : > { %363 = sbr.rel (%p360_p4) target bundleno = 895 (0x37f), region = 48  ;;  %s3467_s13 = sshll.u32 (!%p360_p4), %s365_s14, 4 }
  0x8a   : > { %s366_s10 = scalar_lea.sflag (!%p360_p4), [#allocation8], %s365_s14  ;;  %s4822_s21 = scalar_lea.vmem (!%p360_p4), [#allocation7], %s3467_s13 }
  0x90   : > { %4411 = dma.done.wait (%p4687_p8), %s366_s10, 256  }
  0x91   : > { %4413 = vsyncadd (%p4687_p8), %s366_s10, 4294967040  ;;  %s5305_s6 = sld [smem:[#allocation22_spill]]  ;;  %s5249_s24 = sand.u32 1, %s4456_s22  }
  0x92   : > { %s404_s4 = sand.u32 1, %s4444_s19   ;;  %s417_s30 = sld [smem:[#allocation4 + %s4476_s27]] }
  0x93   : > { %s4833_s16 = sshll.u32 %s5249_s24, 1  ;;  %s4835_s5 = sshll.u32 %s404_s4, 2 }
  0x94   : > { %s5251_s11 = scalar_lea.vmem [#allocation10], %s4833_s16  ;;  %s406_s14 = scalar_lea.vmem [#allocation11], %s4835_s5 }
  0x97   : > { %s411_s2 = sand.u32 1, %s5305_s6  }
  0x98   : > { %s4838_s12 = sshll.u32 %s411_s2, 3  ;;  %s418_s28 = sld [smem:[#allocation5 + %s417_s30]] }
  0x99   : > { %s4840_s18 = sld [smem:[#allocation6 + %s417_s30]]  ;;  %s5250_s13 = scalar_lea.vmem [#allocation13], %s4838_s12 }
  0x9e   : > { %p3472_p8 = scmp.ne.s32.totalorder %s4476_s27, %s418_s28 }
  0x9f   : > { %s420_s15 = sadd.s32 %s4840_s18, %s418_s28  ;;  %v426_v0 = vld [vmem:[%s4822_s21] sm:$0xff] (!%p3472_p8)  ;;  %vm428_vm0 = vcmask (!%p3472_p8), 130048   ;;  %v427_v1 = vld [vmem:[%s4822_s21 + $0x8] sm:$0xff] (!%p3472_p8) }
  0xa0   : > { %s3471_s7 = sadd.s32 4294967295, %s420_s15  ;;  %425 = sbr.rel (%p3472_p8) target bundleno = 167 (0xa7), region = 56  ;;  %429 = vst.msk [vmem:[#allocation2] sm:$0xff] (!%p3472_p8), %vm428_vm0, %v426_v0  ;;  %430 = vst.msk [vmem:[#allocation2 + $0x8] sm:$0xff] (!%p3472_p8), %vm428_vm0, %v427_v1 }
  0xa7 PF: > { %p3473_p0 = scmp.eq.s32.totalorder %s4476_s27, %s418_s28 }
  0xa8   : > { %v435_v2 = vld [vmem:[#allocation2] sm:$0xff] (!%p3473_p0)  ;;  %vm441_vm1 = vcmask (!%p3473_p0), 130048   ;;  %v436_v4 = vld [vmem:[#allocation2 + $0x8] sm:$0xff] (!%p3473_p0) }
  0xa9   : > { %434 = sbr.rel (%p3473_p0) target bundleno = 176 (0xb0), region = 60  ;;  %v437_v3 = vld [vmem:[%s4822_s21] sm:$0xff] (!%p3473_p0)  ;;  %v438_v6 = vld [vmem:[%s4822_s21 + $0x8] sm:$0xff] (!%p3473_p0) }
  0xaa   : > { %v439_v5 = vadd.f32 (!%p3473_p0), %v437_v3, %v435_v2  ;;  %v440_v7 = vadd.f32 (!%p3473_p0), %v438_v6, %v436_v4 }
  0xac   : > { %442 = vst.msk [vmem:[#allocation2] sm:$0xff] (!%p3473_p0), %vm441_vm1, %v439_v5  ;;  %443 = vst.msk [vmem:[#allocation2 + $0x8] sm:$0xff] (!%p3473_p0), %vm441_vm1, %v440_v7 }
  0xb0 PF: > { %p3474_p6 = scmp.ne.s32.totalorder %s4476_s27, %s3471_s7 }
  0xb1   : > { %vm454_vm2 = vcmask (!%p3474_p6), 130048   ;;  %v4500_v10 = vmov (!%p3474_p6), 0.0|0.0   ;;  %vm4501_vm3 = vmmov (!%p3474_p6), 0   ;;  %v4502_v13 = vmov (!%p3474_p6), 0.0   ;;  %s5306_s6 = sld [smem:[#allocation45_spill]] (!%p3474_p6)  ;;  %s5307_s2 = sld [smem:[#allocation47_spill]] (!%p3474_p6) }
  0xb2   : > { %447 = sbr.rel (%p3474_p6) target bundleno = 801 (0x321), region = 64  ;;  %3846 = vmatprep.subr.bf16.mxu0 (!%p3474_p6), %v4500_v10  ;;  %3598 = vmatprep.mubr.msk.f32.mxu0 (!%p3474_p6), %vm4501_vm3, %v4502_v13  ;;  %s5308_s7 = sld [smem:[#allocation49_spill]] (!%p3474_p6)  ;;  %vm1382_vm4 = vcmask (!%p3474_p6), 9216   ;;  %vm2314_vm5 = vcmask (!%p3474_p6), 27648   ;;  %vm3246_vm6 = vcmask (!%p3474_p6), 64512  }
  0xb3   : > { %v452_v8 = vld [vmem:[#allocation2] sm:$0xff] (!%p3474_p6)  ;;  %v453_v9 = vld [vmem:[#allocation2 + $0x8] sm:$0xff] (!%p3474_p6)  ;;  %3864 = vmatprep.subr.bf16.mxu1 (!%p3474_p6), %v4500_v10  ;;  %3640 = vmatprep.mubr.msk.f32.mxu1 (!%p3474_p6), %vm4501_vm3, %v4502_v13  ;;  %s5310_s15 = sld [smem:[#allocation48_spill]] (!%p3474_p6)  ;;  %s5311_s30 = sld [smem:[#allocation50_spill]] (!%p3474_p6) }
  0xb4   : > { %v459_v11 = vand.u32 (!%p3474_p6), 4294901760, %v452_v8  ;;  %v462_v12 = vand.u32 (!%p3474_p6), 4294901760, %v453_v9 }
  0xb6   : > { %v4863_v16 = vpack.c.bf16 (!%p3474_p6), %v462_v12, %v459_v11  ;;  %v537_v17 = vsub.f32 (!%p3474_p6), %v452_v8, %v459_v11  ;;  %v544_v18 = vsub.f32 (!%p3474_p6), %v453_v9, %v462_v12 }
  0xb7   : > { %v449_v14 = vld [vmem:[%s5306_s6] sm:$0x3] (!%p3474_p6)  ;;  %s5309_s6 = sld [smem:[#allocation46_spill]] (!%p3474_p6) }
  0xb8   : > { %v456_v15 = vsel (!%p3474_p6), %vm454_vm2, %v449_v14, 0  ;;  %3848 = vmatpush3.bf16.msra.mxu0 (!%p3474_p6), %v4863_v16  ;;  %v538_v21 = vand.u32 (!%p3474_p6), 4294901760, %v537_v17  ;;  %v545_v22 = vand.u32 (!%p3474_p6), 4294901760, %v544_v18  ;;  %v4873_v31 = vpack.c.bf16 (!%p3474_p6), %v544_v18, %v537_v17  ;;  %v1384_v32 = vld [vmem:[%s5307_s2] sm:$0xf] (!%p3474_p6) }
  0xb9   : > { %v525_v19 = vand.u32 4294901760, %v456_v15  ;;  %3849 = vmatprep.subr.bf16.mxu0 %v4500_v10  ;;  %v1390_v34 = vsel %vm454_vm2, %v1384_v32, 0  ;;  %v2316_v40 = vld [vmem:[%s5308_s7] sm:$0xff]  ;;  %v1386_v8 = vld [vmem:[%s5310_s15 + $0x8] sm:$0xff]  ;;  %s448_s7 = scvt.s32.f32 %s4840_s18 }
  0xba   : > { %v539_v24 = vsub.f32 %v537_v17, %v538_v21  ;;  %v546_v25 = vsub.f32 %v544_v18, %v545_v22  ;;  %v3859_v33 = vpack.c.bf16 %v545_v22, %v538_v21  ;;  %v1459_v35 = vand.u32 4294901760, %v1390_v34  ;;  %v1385_v7 = vld [vmem:[%s5310_s15] sm:$0xff] }
  0xbb   : > { %v526_v20 = vsub.f32 %v456_v15, %v525_v19  ;;  %v2322_v41 = vsel %vm454_vm2, %v2316_v40, 0  ;;  %v1855_v9 = vand.u32 4294901760, %v1385_v7  ;;  %v1858_v11 = vand.u32 4294901760, %v1386_v8  ;;  %v2317_v32 = vld [vmem:[%s5311_s30] sm:$0xff] }
  0xbc   : > { %v540_v27 = vand.u32 4294901760, %v539_v24  ;;  %v547_v28 = vand.u32 4294901760, %v546_v25  ;;  %v1460_v36 = vsub.f32 %v1390_v34, %v1459_v35  ;;  %v2391_v42 = vand.u32 4294901760, %v2322_v41 }
  0xbd   : > { %v527_v23 = vand.u32 4294901760, %v526_v20  ;;  %v450_v47 = vld [vmem:[%s5309_s6] sm:$0xff]  ;;  %v451_v48 = vld [vmem:[%s5309_s6 + $0x8] sm:$0xff]  ;;  %v1933_v12 = vsub.f32 %v1385_v7, %v1855_v9  ;;  %v1940_v14 = vsub.f32 %v1386_v8, %v1858_v11  ;;  %v3901_v24 = vpack.c.bf16 %v1858_v11, %v1855_v9 }
  0xbe   : > { %v4867_v30 = vpack.c.bf16 %v547_v28, %v540_v27  ;;  %v1461_v37 = vand.u32 4294901760, %v1460_v36  ;;  %v2392_v43 = vsub.f32 %v2322_v41, %v2391_v42  ;;  %v921_v49 = vand.u32 4294901760, %v450_v47 }
  0xbf   : > { %v528_v26 = vsub.f32 %v526_v20, %v527_v23  ;;  %v924_v50 = vand.u32 4294901760, %v451_v48  ;;  %v1934_v15 = vand.u32 4294901760, %v1933_v12 }
  0xc0   : > { %v1462_v38 = vsub.f32 %v1460_v36, %v1461_v37  ;;  %v2393_v44 = vand.u32 4294901760, %v2392_v43  ;;  %v999_v52 = vsub.f32 %v450_v47, %v921_v49 }
  0xc1   : > { %v529_v29 = vand.u32 4294901760, %v528_v26  ;;  %v3865_v51 = vpack.c.bf16 %v924_v50, %v921_v49  ;;  %v1006_v53 = vsub.f32 %v451_v48, %v924_v50 }
  0xc2   : > { %v1463_v39 = vand.u32 4294901760, %v1462_v38  ;;  %v2394_v45 = vsub.f32 %v2392_v43, %v2393_v44  ;;  %v1000_v54 = vand.u32 4294901760, %v999_v52 }
  0xc3   : > { %3599 = vmatmul.mubr.f32.vlgmr.msra.gmra.mrb[0].mxu0 %v529_v29  ;;  %3866 = vmatpush3.bf16.msra.mxu1 %v3865_v51  ;;  %v1007_v55 = vand.u32 4294901760, %v1006_v53  ;;  %v3871_v61 = vpack.c.bf16 %v1006_v53, %v999_v52 }
  0xc4   : > { %3851 = vmatpush3.bf16.msra.mxu0 %v4867_v30  ;;  %3605 = vmatprep.mubr.msk.f32.mxu0 %vm4501_vm3, %v4502_v13  ;;  %v2395_v46 = vand.u32 4294901760, %v2394_v45  ;;  %v1001_v56 = vsub.f32 %v999_v52, %v1000_v54 }
  0xc5   : > { %3852 = vmatprep.subr.bf16.mxu0 %v4500_v10  ;;  %3867 = vmatprep.subr.bf16.mxu1 %v4500_v10  ;;  %v1008_v57 = vsub.f32 %v1006_v53, %v1007_v55  ;;  %v3877_v62 = vpack.c.bf16 %v1007_v55, %v1000_v54 }
  0xc6   : > { %v1002_v58 = vand.u32 4294901760, %v1001_v56 }
  0xc7   : > { %v1009_v59 = vand.u32 4294901760, %v1008_v57  ;;  %v1379_v57 = vstv %s448_s7 }
  0xc8   : > { %4188 = vrcp.f32 %v1379_v57 }
  0xc9   : > { %v3868_v60 = vpack.c.bf16 %v1009_v59, %v1002_v58 }
  0xcb   : > { %3606 = vmatmul.mubr.f32.vlgmr.msra.gmra.mrb[0].mxu0 %v525_v19 }
  0xcc   : > { %3854 = vmatpush3.bf16.msra.mxu0 %v4873_v31  ;;  %3612 = vmatprep.mubr.msk.f32.mxu0 %vm4501_vm3, %v4502_v13 }
  0xcd   : > { %3855 = vmatprep.subr.bf16.mxu0 %v4500_v10 }
  0xd2   : > { %v4189_v58 = vpop.eup %4188 }
  0xd3   : > { %3613 = vmatmul.mubr.f32.vlgmr.msra.gmra.mrb[0].mxu0 %v526_v20  ;;  %v1935_v20 = vsub.f32 %v1933_v12, %v1934_v15 }
  0xd4   : > { %3857 = vmatpush3.bf16.msra.mxu0 %v4863_v16  ;;  %3619 = vmatprep.mubr.msk.f32.mxu0 %vm4501_vm3, %v4502_v13 }
  0xd5   : > { %3858 = vmatprep.subr.bf16.mxu0 %v4500_v10  ;;  %v1936_v25 = vand.u32 4294901760, %v1935_v20 }
  0xdb   : > { %3620 = vmatmul.mubr.f32.vlgmr.msra.gmra.mrb[0].mxu0 %v527_v23 }
  0xdc   : > { %3860 = vmatpush3.bf16.msra.mxu0 %v3859_v33  ;;  %3626 = vmatprep.mubr.msk.f32.mxu0 %vm4501_vm3, %v4502_v13 }
  0xdd   : > { %3861 = vmatprep.subr.bf16.mxu0 %v4500_v10 }
  0xe3   : > { %3627 = vmatmul.mubr.f32.vlgmr.msra.gmra.mrb[0].mxu0 %v525_v19 }
  0xe4   : > { %3863 = vmatpush3.bf16.msra.mxu0 %v4863_v16  ;;  %3633 = vmatprep.mubr.msk.f32.mxu0 %vm4501_vm3, %v4502_v13 }
  0xe5   : > { %3882 = vmatprep.subr.bf16.mxu0 %v4500_v10 }
  0xeb   : > { %3634 = vmatmul.mubr.f32.vlgmr.msra.gmra.mrb[0].mxu0 %v525_v19 }
  0xec   : > { %3884 = vmatpush3.bf16.msra.mxu0 %v4863_v16  ;;  %3682 = vmatprep.mubr.msk.f32.mxu0 %vm4501_vm3, %v4502_v13 }
  0xed   : > { %3885 = vmatprep.subr.bf16.mxu0 %v4500_v10 }
  0xef   : > { %3683 = vmatmul.mubr.f32.vlgmr.msra.gmra.mrb[2].mxu0 %v1463_v39 }
  0xf0   : > { %3887 = vmatpush3.bf16.msra.mxu0 %v4867_v30  ;;  %3689 = vmatprep.mubr.msk.f32.mxu0 %vm4501_vm3, %v4502_v13 }
  0xf1   : > { %3888 = vmatprep.subr.bf16.mxu0 %v4500_v10 }
  0xf7   : > { %3690 = vmatmul.mubr.f32.vlgmr.msra.gmra.mrb[2].mxu0 %v1459_v35 }
  0xf8   : > { %3890 = vmatpush3.bf16.msra.mxu0 %v4873_v31  ;;  %3696 = vmatprep.mubr.msk.f32.mxu0 %vm4501_vm3, %v4502_v13 }
  0xf9   : > { %3891 = vmatprep.subr.bf16.mxu0 %v4500_v10 }
  0xff   : > { %3697 = vmatmul.mubr.f32.vlgmr.msra.gmra.mrb[2].mxu0 %v1460_v36 }
 0x100   : > { %3893 = vmatpush3.bf16.msra.mxu0 %v4863_v16  ;;  %3703 = vmatprep.mubr.msk.f32.mxu0 %vm4501_vm3, %v4502_v13 }
 0x101   : > { %3894 = vmatprep.subr.bf16.mxu0 %v4500_v10 }
 0x107   : > { %3704 = vmatmul.mubr.f32.vlgmr.msra.gmra.mrb[2].mxu0 %v1461_v37 }
 0x108   : > { %3896 = vmatpush3.bf16.msra.mxu0 %v3859_v33  ;;  %3710 = vmatprep.mubr.msk.f32.mxu0 %vm4501_vm3, %v4502_v13 }
 0x109   : > { %3897 = vmatprep.subr.bf16.mxu0 %v4500_v10 }
 0x10f   : > { %3711 = vmatmul.mubr.f32.vlgmr.msra.gmra.mrb[2].mxu0 %v1459_v35 }
 0x110   : > { %3899 = vmatpush3.bf16.msra.mxu0 %v4863_v16  ;;  %3717 = vmatprep.mubr.msk.f32.mxu0 %vm4501_vm3, %v4502_v13 }
 0x111   : > { %3918 = vmatprep.subr.bf16.mxu0 %v4500_v10 }
 0x117   : > { %3718 = vmatmul.mubr.f32.vlgmr.msra.gmra.mrb[2].mxu0 %v1459_v35  ;;  %v2787_v35 = vand.u32 4294901760, %v2317_v32 }
 0x118   : > { %3920 = vmatpush3.bf16.msra.mxu0 %v4863_v16  ;;  %3766 = vmatprep.mubr.msk.f32.mxu0 %vm4501_vm3, %v4502_v13 }
 0x119   : > { %3921 = vmatprep.subr.bf16.mxu0 %v4500_v10  ;;  %v2865_v37 = vsub.f32 %v2317_v32, %v2787_v35 }
 0x11b   : > { %3767 = vmatmul.mubr.f32.vlgmr.msra.gmra.mrb[4].mxu0 %v2395_v46  ;;  %v2866_v39 = vand.u32 4294901760, %v2865_v37 }
 0x11c   : > { %3923 = vmatpush3.bf16.msra.mxu0 %v4867_v30  ;;  %3773 = vmatprep.mubr.msk.f32.mxu0 %vm4501_vm3, %v4502_v13 }
 0x11d   : > { %3924 = vmatprep.subr.bf16.mxu0 %v4500_v10 }
 0x123   : > { %3774 = vmatmul.mubr.f32.vlgmr.msra.gmra.mrb[4].mxu0 %v2391_v42 }
 0x124   : > { %3926 = vmatpush3.bf16.msra.mxu0 %v4873_v31  ;;  %3780 = vmatprep.mubr.msk.f32.mxu0 %vm4501_vm3, %v4502_v13  ;;  %v3907_v31 = vpack.c.bf16 %v1940_v14, %v1933_v12 }
 0x125   : > { %3927 = vmatprep.subr.bf16.mxu0 %v4500_v10 }
 0x12b   : > { %3781 = vmatmul.mubr.f32.vlgmr.msra.gmra.mrb[4].mxu0 %v2392_v43 }
 0x12c   : > { %3929 = vmatpush3.bf16.msra.mxu0 %v4863_v16  ;;  %3787 = vmatprep.mubr.msk.f32.mxu0 %vm4501_vm3, %v4502_v13 }
 0x12d   : > { %3930 = vmatprep.subr.bf16.mxu0 %v4500_v10 }
 0x133   : > { %3788 = vmatmul.mubr.f32.vlgmr.msra.gmra.mrb[4].mxu0 %v2393_v44  ;;  %v2867_v44 = vsub.f32 %v2865_v37, %v2866_v39 }
 0x134   : > { %3932 = vmatpush3.bf16.msra.mxu0 %v3859_v33  ;;  %3794 = vmatprep.mubr.msk.f32.mxu0 %vm4501_vm3, %v4502_v13  ;;  %v2318_v33 = vld [vmem:[%s5311_s30 + $0x8] sm:$0xff] }
 0x135   : > { %3933 = vmatprep.subr.bf16.mxu0 %v4500_v10  ;;  %v2790_v36 = vand.u32 4294901760, %v2318_v33  ;;  %v2868_v49 = vand.u32 4294901760, %v2867_v44 }
 0x137   : > { %v2872_v38 = vsub.f32 %v2318_v33, %v2790_v36  ;;  %v3937_v48 = vpack.c.bf16 %v2790_v36, %v2787_v35 }
 0x139   : > { %v2873_v40 = vand.u32 4294901760, %v2872_v38  ;;  %v3943_v55 = vpack.c.bf16 %v2872_v38, %v2865_v37 }
 0x13b   : > { %3795 = vmatmul.mubr.f32.vlgmr.msra.gmra.mrb[4].mxu0 %v2391_v42  ;;  %v2874_v45 = vsub.f32 %v2872_v38, %v2873_v40  ;;  %v3949_v56 = vpack.c.bf16 %v2873_v40, %v2866_v39 }
 0x13c   : > { %3935 = vmatpush3.bf16.msra.mxu0 %v4863_v16  ;;  %3801 = vmatprep.mubr.msk.f32.mxu0 %vm4501_vm3, %v4502_v13  ;;  %v1941_v16 = vand.u32 4294901760, %v1940_v14 }
 0x13d   : > { %v2875_v50 = vand.u32 4294901760, %v2874_v45 }
 0x13e   : > { %v1942_v21 = vsub.f32 %v1940_v14, %v1941_v16  ;;  %v3913_v34 = vpack.c.bf16 %v1941_v16, %v1934_v15 }
 0x13f   : > { %v3940_v53 = vpack.c.bf16 %v2875_v50, %v2868_v49 }
 0x140   : > { %v1943_v26 = vand.u32 4294901760, %v1942_v21 }
 0x142   : > { %v3904_v29 = vpack.c.bf16 %v1943_v26, %v1936_v25 }
 0x143   : > { %3802 = vmatmul.mubr.f32.vlgmr.msra.gmra.mrb[4].mxu0 %v2391_v42 }
 0x1be   : > { %v913_v63 = vpop.f32.mrb[0].mxu0 }
 0x1bf   : > { %v918_v0 = vsel %vm454_vm2, %v913_v63, 0  ;;  %v3635_v1 = vpop.f32.mrb[1].mxu0 }
 0x1c0   : > { %v987_v2 = vand.u32 4294901760, %v918_v0 }
 0x1c2   : > { %v988_v3 = vsub.f32 %v918_v0, %v987_v2 }
 0x1c4   : > { %v989_v4 = vand.u32 4294901760, %v988_v3 }
 0x1c6   : > { %v990_v5 = vsub.f32 %v988_v3, %v989_v4 }
 0x1c8   : > { %v991_v6 = vand.u32 4294901760, %v990_v5 }
 0x1ca   : > { %3641 = vmatmul.mubr.f32.vlgmr.msra.gmra.mrb[0].mxu1 %v991_v6 }
 0x1cb   : > { %3869 = vmatpush3.bf16.msra.mxu1 %v3868_v60  ;;  %3647 = vmatprep.mubr.msk.f32.mxu1 %vm4501_vm3, %v4502_v13 }
 0x1cc   : > { %3870 = vmatprep.subr.bf16.mxu1 %v4500_v10 }
 0x1d2   : > { %3648 = vmatmul.mubr.f32.vlgmr.msra.gmra.mrb[0].mxu1 %v987_v2 }
 0x1d3   : > { %3872 = vmatpush3.bf16.msra.mxu1 %v3871_v61  ;;  %3654 = vmatprep.mubr.msk.f32.mxu1 %vm4501_vm3, %v4502_v13 }
 0x1d4   : > { %3873 = vmatprep.subr.bf16.mxu1 %v4500_v10 }
 0x1da   : > { %3655 = vmatmul.mubr.f32.vlgmr.msra.gmra.mrb[0].mxu1 %v988_v3 }
 0x1db   : > { %3875 = vmatpush3.bf16.msra.mxu1 %v3865_v51  ;;  %3661 = vmatprep.mubr.msk.f32.mxu1 %vm4501_vm3, %v4502_v13 }
 0x1dc   : > { %3876 = vmatprep.subr.bf16.mxu1 %v4500_v10 }
 0x1e2   : > { %3662 = vmatmul.mubr.f32.vlgmr.msra.gmra.mrb[0].mxu1 %v989_v4 }
 0x1e3   : > { %3878 = vmatpush3.bf16.msra.mxu1 %v3877_v62  ;;  %3668 = vmatprep.mubr.msk.f32.mxu1 %vm4501_vm3, %v4502_v13 }
 0x1e4   : > { %3879 = vmatprep.subr.bf16.mxu1 %v4500_v10 }
 0x1ea   : > { %3669 = vmatmul.mubr.f32.vlgmr.msra.gmra.mrb[0].mxu1 %v987_v2  ;;  %v1847_v17 = vpop.f32.mrb[2].mxu0 }
 0x1eb   : > { %v1852_v18 = vsel %vm454_vm2, %v1847_v17, 0  ;;  %3881 = vmatpush3.bf16.msra.mxu1 %v3865_v51  ;;  %v3719_v19 = vpop.f32.mrb[3].mxu0  ;;  %3675 = vmatprep.mubr.msk.f32.mxu1 %vm4501_vm3, %v4502_v13 }
 0x1ec   : > { %v1921_v22 = vand.u32 4294901760, %v1852_v18  ;;  %3900 = vmatprep.subr.bf16.mxu1 %v4500_v10 }
 0x1ee   : > { %v1922_v23 = vsub.f32 %v1852_v18, %v1921_v22 }
 0x1f0   : > { %v1923_v27 = vand.u32 4294901760, %v1922_v23 }
 0x1f2   : > { %v1924_v28 = vsub.f32 %v1922_v23, %v1923_v27  ;;  %3676 = vmatmul.mubr.f32.vlgmr.msra.gmra.mrb[0].mxu1 %v987_v2 }
 0x1f3   : > { %3902 = vmatpush3.bf16.msra.mxu1 %v3901_v24  ;;  %3724 = vmatprep.mubr.msk.f32.mxu1 %vm4501_vm3, %v4502_v13 }
 0x1f4   : > { %v1925_v30 = vand.u32 4294901760, %v1924_v28  ;;  %3903 = vmatprep.subr.bf16.mxu1 %v4500_v10 }
 0x1f6   : > { %3725 = vmatmul.mubr.f32.vlgmr.msra.gmra.mrb[2].mxu1 %v1925_v30 }
 0x1f7   : > { %3905 = vmatpush3.bf16.msra.mxu1 %v3904_v29  ;;  %3731 = vmatprep.mubr.msk.f32.mxu1 %vm4501_vm3, %v4502_v13 }
 0x1f8   : > { %3906 = vmatprep.subr.bf16.mxu1 %v4500_v10 }
 0x1fe   : > { %3732 = vmatmul.mubr.f32.vlgmr.msra.gmra.mrb[2].mxu1 %v1921_v22 }
 0x1ff   : > { %3908 = vmatpush3.bf16.msra.mxu1 %v3907_v31  ;;  %3738 = vmatprep.mubr.msk.f32.mxu1 %vm4501_vm3, %v4502_v13 }
 0x200   : > { %3909 = vmatprep.subr.bf16.mxu1 %v4500_v10 }
 0x206   : > { %3739 = vmatmul.mubr.f32.vlgmr.msra.gmra.mrb[2].mxu1 %v1922_v23 }
 0x207   : > { %3911 = vmatpush3.bf16.msra.mxu1 %v3901_v24  ;;  %3745 = vmatprep.mubr.msk.f32.mxu1 %vm4501_vm3, %v4502_v13 }
 0x208   : > { %3912 = vmatprep.subr.bf16.mxu1 %v4500_v10 }
 0x20e   : > { %3746 = vmatmul.mubr.f32.vlgmr.msra.gmra.mrb[2].mxu1 %v1923_v27 }
 0x20f   : > { %3914 = vmatpush3.bf16.msra.mxu1 %v3913_v34  ;;  %3752 = vmatprep.mubr.msk.f32.mxu1 %vm4501_vm3, %v4502_v13 }
 0x210   : > { %3915 = vmatprep.subr.bf16.mxu1 %v4500_v10 }
 0x216   : > { %3753 = vmatmul.mubr.f32.vlgmr.msra.gmra.mrb[2].mxu1 %v1921_v22  ;;  %v2779_v41 = vpop.f32.mrb[4].mxu0 }
 0x217   : > { %v2784_v42 = vsel %vm454_vm2, %v2779_v41, 0  ;;  %3917 = vmatpush3.bf16.msra.mxu1 %v3901_v24  ;;  %v3803_v43 = vpop.f32.mrb[5].mxu0  ;;  %3759 = vmatprep.mubr.msk.f32.mxu1 %vm4501_vm3, %v4502_v13 }
 0x218   : > { %v2853_v46 = vand.u32 4294901760, %v2784_v42  ;;  %3936 = vmatprep.subr.bf16.mxu1 %v4500_v10 }
 0x21a   : > { %v2854_v47 = vsub.f32 %v2784_v42, %v2853_v46 }
 0x21c   : > { %v2855_v51 = vand.u32 4294901760, %v2854_v47 }
 0x21e   : > { %v2856_v52 = vsub.f32 %v2854_v47, %v2855_v51  ;;  %3760 = vmatmul.mubr.f32.vlgmr.msra.gmra.mrb[2].mxu1 %v1921_v22 }
 0x21f   : > { %3938 = vmatpush3.bf16.msra.mxu1 %v3937_v48  ;;  %3808 = vmatprep.mubr.msk.f32.mxu1 %vm4501_vm3, %v4502_v13 }
 0x220   : > { %v2857_v54 = vand.u32 4294901760, %v2856_v52  ;;  %3939 = vmatprep.subr.bf16.mxu1 %v4500_v10 }
 0x222   : > { %3809 = vmatmul.mubr.f32.vlgmr.msra.gmra.mrb[4].mxu1 %v2857_v54 }
 0x223   : > { %3941 = vmatpush3.bf16.msra.mxu1 %v3940_v53  ;;  %3815 = vmatprep.mubr.msk.f32.mxu1 %vm4501_vm3, %v4502_v13 }
 0x224   : > { %3942 = vmatprep.subr.bf16.mxu1 %v4500_v10 }
 0x22a   : > { %3816 = vmatmul.mubr.f32.vlgmr.msra.gmra.mrb[4].mxu1 %v2853_v46 }
 0x22b   : > { %3944 = vmatpush3.bf16.msra.mxu1 %v3943_v55  ;;  %3822 = vmatprep.mubr.msk.f32.mxu1 %vm4501_vm3, %v4502_v13 }
 0x22c   : > { %3945 = vmatprep.subr.bf16.mxu1 %v4500_v10 }
 0x232   : > { %3823 = vmatmul.mubr.f32.vlgmr.msra.gmra.mrb[4].mxu1 %v2854_v47 }
 0x233   : > { %3947 = vmatpush3.bf16.msra.mxu1 %v3937_v48  ;;  %3829 = vmatprep.mubr.msk.f32.mxu1 %vm4501_vm3, %v4502_v13 }
 0x234   : > { %3948 = vmatprep.subr.bf16.mxu1 %v4500_v10 }
 0x23a   : > { %3830 = vmatmul.mubr.f32.vlgmr.msra.gmra.mrb[4].mxu1 %v2855_v51 }
 0x23b   : > { %3950 = vmatpush3.bf16.msra.mxu1 %v3949_v56  ;;  %3836 = vmatprep.mubr.msk.f32.mxu1 %vm4501_vm3, %v4502_v13 }
 0x23c   : > { %3951 = vmatprep.subr.bf16.mxu1 %v4500_v10 }
 0x242   : > { %3837 = vmatmul.mubr.f32.vlgmr.msra.gmra.mrb[4].mxu1 %v2853_v46 }
 0x243   : > { %3953 = vmatpush3.bf16.msra.mxu1 %v3937_v48  ;;  %3843 = vmatprep.mubr.msk.f32.mxu1 %vm4501_vm3, %v4502_v13 }
 0x24a   : > { %3844 = vmatmul.mubr.f32.vlgmr.msra.gmra.mrb[4].mxu1 %v2853_v46 }
 0x2c5   : > { %v1375_v59 = vpop.f32.mrb[0].mxu1 }
 0x2c6   : > { %v1381_v60 = vmul.f32 %v4189_v58, %v1375_v59  ;;  %v3677_v61 = vpop.f32.mrb[1].mxu1 }
 0x2c8   : > { %1383 = vst.msk [vmem:[%s5251_s11] sm:$0x3] %vm1382_vm4, %v1381_v60 }
 0x2f1   : > { %v2309_v62 = vpop.f32.mrb[2].mxu1 }
 0x2f2   : > { %v2313_v10 = vmul.f32 %v4189_v58, %v2309_v62  ;;  %v3761_v63 = vpop.f32.mrb[3].mxu1 }
 0x2f4   : > { %2315 = vst.msk [vmem:[%s406_s14] sm:$0xf] %vm2314_vm5, %v2313_v10 }
 0x31d   : > { %v3241_v0 = vpop.f32.mrb[4].mxu1 }
 0x31e   : > { %v3245_v13 = vmul.f32 %v4189_v58, %v3241_v0  ;;  %v3845_v1 = vpop.f32.mrb[5].mxu1 }
 0x320   : > { %3247 = vst.msk [vmem:[%s5250_s13] sm:$0xff] %vm3246_vm6, %v3245_v13 }
 0x321 PF: > { %s5312_s18 = sld [smem:[#allocation32_spill]]  ;;  %s5313_s10 = sld [smem:[#allocation39_spill]] }
 0x322   : > { %s5314_s21 = sld [smem:[#allocation36_spill]]  ;;  %s5315_s4 = sld [smem:[#allocation41_spill]] }
 0x323   : > { %s5316_s2 = sld [smem:[#allocation29_spill]]  ;;  %s3291_s13 = sshll.u32 %s406_s14, 4  ;;  %s5037_s13 = int_to_ptr.vmem [resolvable:$true] %s3291_s13 }
 0x324   : > { %s5321_s25 = sld [smem:[#allocation52_spill]]  ;;  %s5323_s19 = scalar_lea.vmem [#allocation13], %s4838_s12 }
 0x325   : > { %s5058_s9 = sshll.u32 %s5323_s19, 4  ;;  %s5090_s9 = int_to_ptr.vmem [resolvable:$true] %s5058_s9 }
 0x327   : > { %s3253_s28 = sand.u32 1, %s5312_s18   ;;  %p5317_p11 = scmp.ne.s32.totalorder %s5313_s10, 0 }
 0x328   : > { %p5318_p9 = scmp.ne.s32.totalorder %s5314_s21, 0  ;;  %p5319_p5 = scmp.ne.s32.totalorder %s5315_s4, 0 }
 0x329   : > { %s4019_s7 = scalar_select %p5317_p11, [#allocation4], [#allocation15] }
 0x32a   : > { %s4020_s24 = scalar_select %p5317_p11, %s4476_s27, 0 }
 0x32b   : > { %s4016_s3 = scalar_select %p5318_p9, [#allocation4], [#allocation14] }
 0x32c   : > { %s3282_s11 = sld [smem:[%s4019_s7 + %s4020_s24]]  ;;  %s5320_s7 = scalar_lea.vmem [#allocation10], %s4833_s16 }
 0x32d   : > { %s4017_s6 = scalar_select %p5318_p9, %s4476_s27, 0 }
 0x32e   : > { %s4022_s15 = scalar_select %p5319_p5, [#allocation4], [#allocation16] }
 0x32f   : > { %s5039_s18 = sld [smem:[%s4016_s3 + %s4017_s6]]  ;;  %s5360_s27 = smov (!%p5319_p5, %s4476_s27), 0 }
 0x330   : > { %s5045_s14 = sld [smem:[%s4022_s15 + %s5360_s27]]  ;;  %s5049_s0 = sshll.u32 %s5320_s7, 4  ;;  %s5086_s0 = int_to_ptr.vmem [resolvable:$true] %s5049_s0 }
 0x331   : > { %s5322_s8 = smov %s5321_s25  ;;  %s5060_s3 = scalar_lea.sflag [#allocation12], %s3253_s28 }
 0x332   : > { %s3480_s30 = sshll.u32 %s3282_s11, 1  ;;  %s4256_s6 = scalar_lea.vmem %s5037_s13, 64 }
 0x333   : > { %s3287_s5 = sadd.s32 %s5316_s2, %s3480_s30  ;;  %p4257_p13 = scmp.ne.s32.totalorder %s5037_s13, %s4256_s6 }
 0x334   : > { %s3481_s24 = sshll.u32 %s3287_s5, 6  ;;  %s4503_s27 = smov [#allocation11]  }
 0x335   : > { %s5054_s20 = scalar_lea.hbm %s5321_s25, %s3481_s24  ;;  %p4258_p7 = pnand %p4257_p13, %p5317_p11 }
 0x336   : > { %s4260_s11 = sshll.u32 %s4503_s27, 4  ;;  %s4261_s11 = int_to_ptr.vmem [resolvable:$false] %s4260_s11 }
 0x337   : > { %p4259_p10 = pneg %p4258_p7  ;;  %s4262_s16 = scalar_lea.vmem %s4261_s11, 128 }
 0x338   : > { %p4263_p2 = scmp.lt.s32.totalorder %s5037_s13, %s4261_s11  ;;  %p4264_p3 = scmp.lt.s32.totalorder %s4262_s16, %s4256_s6 }
 0x33a   : > { %p4265_p1 = por %p4264_p3, %p4263_p2 }
 0x33c   : > { %p4266_p12 = pnand %p4265_p1, %p4259_p10 }
 0x33e   : > { %4269 = shalt.err (!%p4266_p12)
}
 0x33f   : > { %s4270_s19 = scalar_lea.hbm %s5054_s20, 64  ;;  %s4274_s29 = scalar_lea.hbm %s5322_s8, 256 }
 0x340   : > { %p4271_p4 = scmp.ne.s32.totalorder %s5054_s20, %s4270_s19  ;;  %p4275_p6 = scmp.lt.u32.totalorder %s5054_s20, %s5322_s8 }
 0x341   : > { %p4276_p13 = scmp.lt.u32.totalorder %s4274_s29, %s4270_s19  ;;  %p4278_p10 = scmp.lt.u32.totalorder %s4270_s19, %s5054_s20 }
 0x342   : > { %p4272_p8 = pnand %p4271_p4, %p5317_p11 }
 0x343   : > { %p4277_p7 = por %p4276_p13, %p4275_p6 }
 0x344   : > { %p4273_p0 = pneg %p4272_p8 }
 0x345   : > { %p4279_p2 = por %p4278_p10, %p4277_p7 }
 0x347   : > { %p4280_p3 = pnand %p4279_p2, %p4273_p0 }
 0x349   : > { %4283 = shalt.err (!%p4280_p3)
}
 0x34a   : > { %4021 = dma.vmem_to_hbm [thread:$0]  (%p5317_p11), %s5037_s13, 64, %s5054_s20, %s5060_s3  }
 0x34b   : > { %s3478_s30 = sshll.u32 %s5039_s18, 1  ;;  %s3482_s5 = sshll.u32 %s5045_s14, 1 }
 0x34c   : > { %s3271_s28 = sadd.s32 %s5316_s2, %s3478_s30  ;;  %s5324_s6 = sld [smem:[#allocation51_spill]] }
 0x34d   : > { %s3479_s10 = sshll.u32 %s3271_s28, 5  ;;  %s5099_s11 = sadd.s32 %s5316_s2, %s3482_s5 }
 0x34e   : > { %s5325_s16 = sand.u32 1, %s4456_s22   ;;  %s4284_s13 = scalar_lea.vmem %s5086_s0, 32 }
 0x34f   : > { %s3249_s20 = scalar_lea.sflag [#allocation9], %s5325_s16  ;;  %p4285_p11 = scmp.ne.s32.totalorder %s5086_s0, %s4284_s13 }
 0x350   : > { %s4504_s18 = smov [#allocation10]  }
 0x351   : > { %p4286_p1 = pnand %p4285_p11, %p5318_p9  ;;  %s4288_s19 = sshll.u32 %s4504_s18, 4  ;;  %s4289_s19 = int_to_ptr.vmem [resolvable:$false] %s4288_s19 }
 0x352   : > { %s5096_s27 = scalar_lea.hbm %s5324_s6, %s3479_s10  ;;  %s4290_s25 = scalar_lea.vmem %s4289_s19, 64 }
 0x353   : > { %p4287_p12 = pneg %p4286_p1  ;;  %p4291_p4 = scmp.lt.s32.totalorder %s5086_s0, %s4289_s19 }
 0x354   : > { %p4292_p8 = scmp.lt.s32.totalorder %s4290_s25, %s4284_s13 }
 0x356   : > { %p4293_p0 = por %p4292_p8, %p4291_p4 }
 0x358   : > { %p4294_p6 = pnand %p4293_p0, %p4287_p12 }
 0x35a   : > { %4297 = shalt.err (!%p4294_p6)
}
 0x35b   : > { %s4298_s2 = scalar_lea.hbm %s5096_s27, 32  ;;  %s4302_s29 = scalar_lea.hbm %s5324_s6, 128 }
 0x35c   : > { %p4299_p13 = scmp.ne.s32.totalorder %s5096_s27, %s4298_s2  ;;  %p4303_p2 = scmp.lt.u32.totalorder %s5096_s27, %s5324_s6 }
 0x35d   : > { %p4304_p3 = scmp.lt.u32.totalorder %s4302_s29, %s4298_s2  ;;  %p4306_p1 = scmp.lt.u32.totalorder %s4298_s2, %s5096_s27 }
 0x35e   : > { %p4300_p7 = pnand %p4299_p13, %p5318_p9 }
 0x35f   : > { %p4305_p11 = por %p4304_p3, %p4303_p2 }
 0x360   : > { %p4301_p10 = pneg %p4300_p7 }
 0x361   : > { %p4307_p12 = por %p4306_p1, %p4305_p11 }
 0x363   : > { %p4308_p4 = pnand %p4307_p12, %p4301_p10 }
 0x365   : > { %4311 = shalt.err (!%p4308_p4)
}
 0x366   : > { %4018 = dma.vmem_to_hbm [thread:$0]  (%p5318_p9), %s5086_s0, 32, %s5096_s27, %s3249_s20  }
 0x367   : > { %s3483_s30 = sshll.u32 %s5099_s11, 7  ;;  %s5326_s5 = sld [smem:[#allocation53_spill]] }
 0x368   : > { %s4312_s7 = scalar_lea.vmem %s5090_s9, 128  ;;  %s4505_s16 = smov [#allocation13]  }
 0x369   : > { %p4313_p8 = scmp.ne.s32.totalorder %s5090_s9, %s4312_s7  ;;  %s4316_s21 = sshll.u32 %s4505_s16, 4  ;;  %s4317_s21 = int_to_ptr.vmem [resolvable:$false] %s4316_s21 }
 0x36a   : > { %s4318_s13 = scalar_lea.vmem %s4317_s21, 256  ;;  %p4319_p13 = scmp.lt.s32.totalorder %s5090_s9, %s4317_s21 }
 0x36b   : > { %p4314_p0 = pnand %p4313_p8, %p5319_p5  ;;  %p4320_p7 = scmp.lt.s32.totalorder %s4318_s13, %s4312_s7 }
 0x36d   : > { %s3305_s24 = scalar_lea.hbm %s5326_s5, %s3483_s30  ;;  %p4315_p6 = pneg %p4314_p0 }
 0x36e   : > { %p4321_p10 = por %p4320_p7, %p4319_p13 }
 0x370   : > { %p4322_p2 = pnand %p4321_p10, %p4315_p6 }
 0x372   : > { %4325 = shalt.err (!%p4322_p2)
}
 0x373   : > { %s4326_s0 = scalar_lea.hbm %s3305_s24, 128  ;;  %s4330_s20 = scalar_lea.hbm %s5326_s5, 512 }
 0x374   : > { %p4327_p9 = scmp.ne.s32.totalorder %s3305_s24, %s4326_s0  ;;  %p4331_p1 = scmp.lt.u32.totalorder %s3305_s24, %s5326_s5 }
 0x375   : > { %p4332_p12 = scmp.lt.u32.totalorder %s4330_s20, %s4326_s0  ;;  %p4334_p8 = scmp.lt.u32.totalorder %s4326_s0, %s3305_s24 }
 0x376   : > { %p4328_p3 = pnand %p4327_p9, %p5319_p5 }
 0x377   : > { %p4333_p4 = por %p4332_p12, %p4331_p1 }
 0x378   : > { %p4329_p11 = pneg %p4328_p3 }
 0x379   : > { %p4335_p0 = por %p4334_p8, %p4333_p4 }
 0x37b   : > { %p4336_p6 = pnand %p4335_p0, %p4329_p11 }
 0x37d   : > { %4339 = shalt.err (!%p4336_p6)
}
 0x37e   : > { %4024 = dma.vmem_to_hbm [thread:$0]  (%p5319_p5), %s5090_s9, 128, %s3305_s24, %s5060_s3  }
 0x37f PF: > { %s5327_s25 = sld [smem:[#allocation25_spill]]  ;;  %s5328_s2 = sld [smem:[#allocation37_spill]] }
 0x380   : > { %p4043_p13 = scmp.ge.s32.totalorder %s4492_s1, 2 }
 0x385   : > { %s3319_s14 = sand.u32 1, %s5327_s25   ;;  %p5329_p7 = scmp.ne.s32.totalorder %s5328_s2, 0 }
 0x386   : > { %s3320_s26 = scalar_lea.sflag [#allocation9], %s3319_s14 }
 0x387   : > { %p4033_p10 = pnand %p4043_p13, %p5329_p7 }
 0x389   : > { %4415 = dma.done.wait (!%p4033_p10), %s3320_s26, 32  }
 0x38a   : > { %4417 = vsyncadd (!%p4033_p10), %s3320_s26, 4294967264  ;;  %s5330_s29 = sadd.s32 4294967294, %s4492_s1   ;;  %s5331_s12 = sld [smem:[#allocation40_spill]] }
 0x38b   : > { %s3328_s15 = sand.u32 1, %s5330_s29  }
 0x38c   : > { %s3329_s4 = scalar_lea.sflag [#allocation12], %s3328_s15 }
 0x390   : > { %p5332_p2 = scmp.ne.s32.totalorder %s5331_s12, 0 }
 0x392   : > { %p4036_p9 = pnand %p4043_p13, %p5332_p2 }
 0x394   : > { %4419 = dma.done.wait (!%p4036_p9), %s3329_s4, 64  }
 0x395   : > { %4421 = vsyncadd (!%p4036_p9), %s3329_s4, 4294967232  ;;  %p5333_p5 = scmp.ne.s32.totalorder %s5300_s23, 0 }
 0x397   : > { %p4039_p3 = pnand %p4043_p13, %p5333_p5 }
 0x399   : > { %4423 = dma.done.wait (!%p4039_p3), %s3329_s4, 128  }
 0x39a   : > { %4425 = vsyncadd (!%p4039_p3), %s3329_s4, 4294967168  ;;  %s46_s1 = sadd.s32 1, %s4492_s1   ;;  %s5335_s2 = sld [smem:[#allocation22_spill]] }
 0x39b   : > { %p5156_p11 = scmp.ge.s32.totalorder %s46_s1, 12   ;;  %s5336_s3 = sld [smem:[#allocation43_spill]] }
 0x39c   : > { %s5337_s18 = sld [smem:[#allocation23_spill]]  ;;  %s5338_s19 = sld [smem:[#allocation24_spill]] }
 0x39d   : > { %s5339_s20 = sld [smem:[#allocation42_spill]]  ;;  %s5340_s30 = sld [smem:[#allocation26_spill]] }
 0x39e   : > { %s5341_s23 = sld [smem:[#allocation38_spill]]  ;;  %s5342_s24 = sld [smem:[#allocation27_spill]] }
 0x39f   : > { %s5343_s25 = sld [smem:[#allocation28_spill]]  ;;  %s5344_s26 = sld [smem:[#allocation35_spill]] }
 0x3a0   : > { %s5345_s27 = sld [smem:[#allocation30_spill]]  ;;  %s5346_s28 = sld [smem:[#allocation31_spill]] }
 0x3a1   : > { %s5347_s29 = sld [smem:[#allocation33_spill]]  ;;  %s5348_s0 = sld [smem:[#allocation34_spill]] }
 0x3a2   : > { %s5349_s16 = smov %s4436_s17  ;;  %s5350_s17 = smov %s5336_s3 }
 0x3a3   : > { %s5351_s21 = smov %s4456_s22  ;;  %s5352_s22 = smov %s5340_s30 }
 0x3a4   :  { %45 = sbr.rel (!%p5156_p11) target bundleno = 52 (0x34), region = 137 }
 0x3ab   :  { %3343 = vsyncpa [#allocation8], 1 }
 0x3ac   :  { %3345 = vsyncpa [#allocation8 + $0x1], 1 }
 0x3ad   :  { %3346 = vsyncpa [#allocation9], 1 }
 0x3ae   :  { %3348 = vsyncpa [#allocation9 + $0x1], 1 }
 0x3af   :  { %3349 = vsyncpa [#allocation12], 1 }
 0x3b0   :  { %3351 = vsyncpa [#allocation12 + $0x1], 1 }

</bundles_post_ra>
